<compile_context>
chip_gen: v6e
topology: v6e:2x2x1
jax: 0.10.0
libtpu: 0.0.40
codegen_flags: <defaults>
</compile_context>

<pallas_src>
import numpy as np
import jax
import jax.numpy as jnp
from jax import lax
from jax.experimental import pallas as pl
from jax.experimental.pallas import tpu as pltpu

# ---- module configuration (event_embed(shape=(H, W), group_num=12, patch_size=4)) ----
H, W = 16, 16
GROUP_NUM = 12
PATCH = 4
TIME_DIV = GROUP_NUM // 2              # 6
PH, PW = H // PATCH, W // PATCH        # 4, 4
TOKEN_NUM = PH * PW                    # 16
PATCH_SIZE = PATCH * PATCH             # 16
N_BINS = TIME_DIV * 2 * PATCH_SIZE * TOKEN_NUM   # 3072
N_LO = 128                              # lane factor of the histogram
N_HI = N_BINS // N_LO                   # 24 (sublane factor)
EPS = 1e-4


def event_token_kernel(tparams_ref, ev_ref, out_ref):
    """Grid = (batch, event-chunk). Accumulates a (48, 128) factorized histogram."""
    b = pl.program_id(0)
    k = pl.program_id(1)

    @pl.when(k == 0)
    def _init():
        out_ref[...] = jnp.zeros_like(out_ref)

    ev = ev_ref[0]                          # (4, S, 128) -- sublane-dense events
    t = ev[0]                               # (S, 128)
    xs = ev[1]
    ys = ev[2]
    pol = ev[3]
    S = t.shape[0]

    # Hoisted per-batch scalars (first / last valid timestamp) from SMEM (1-D table).
    t0 = tparams_ref[2 * b]
    t_last = tparams_ref[2 * b + 1]

    valid = t != jnp.inf                    # padded events have t == +inf
    t_c = jnp.where(valid, t, 0.0)

    # Per-event weights; exactly zero for padded events so their (garbage) bins
    # can never contribute, regardless of what the int casts below produce.
    w = jnp.where(valid & (pol != 2.0), 1.0, 0.0)
    wt = jnp.where(valid, 1.0 - (t_c - t0) / (t_last - t0 + 1e-4), 0.0)

    # per-event multi-indices
    # TODO(synk): torch computes DTime in float64; TPU kernel uses float32.
    dtime = jnp.floor(TIME_DIV * (t_c - t0) / (t_last - t0 + 1.0))
    div_w = (W - 1) / PW + EPS
    div_h = (H - 1) / PH + EPS
    position = jnp.floor(xs / div_w) + jnp.floor(ys / div_h) * PW
    token = (jnp.floor(jnp.mod(xs, div_w))
             + jnp.floor(jnp.mod(ys, div_h)) * int((W + 1) / PW))

    def clamp_to(v, hi_bound):
        vi = v.astype(jnp.int32)
        return jnp.minimum(jnp.maximum(vi, 0), hi_bound)

    # NOTE: clamps to bins (not bins-1) to match the torch reference quirk.
    d_i = clamp_to(dtime, TIME_DIV)
    p_i = clamp_to(pol, 2)
    t_i = clamp_to(token, PATCH_SIZE)
    q_i = clamp_to(position, TOKEN_NUM)

    flat = (d_i * (2 * PATCH_SIZE * TOKEN_NUM)
            + p_i * (PATCH_SIZE * TOKEN_NUM)
            + t_i * TOKEN_NUM
            + q_i)                                          # (S, 128) int32, >= 0

    hi = flat >> 7                                          # flat // 128 (sublane bin)
    lo = flat & (N_LO - 1)                                  # flat %  128 (lane bin)

    hi_iota = lax.broadcasted_iota(jnp.int32, (N_HI, N_LO), 0)   # (24, 128)
    lo_iota = lax.broadcasted_iota(jnp.int32, (N_LO, N_LO), 0)   # (128, 128)

    acc_w = jnp.zeros((N_HI, N_LO), jnp.float32)
    acc_wt = jnp.zeros((N_HI, N_LO), jnp.float32)
    dn = (((1,), (1,)), ((), ()))
    for s in range(S):                      # static unroll over 128-event sub-rows
        hi_s = hi[s:s + 1, :]               # (1, 128)
        lo_s = lo[s:s + 1, :]
        hi_mask = hi_iota == hi_s                                    # (24, 128)
        a_w = jnp.where(hi_mask, w[s:s + 1, :], 0.0)                 # fused cast*weight
        a_wt = jnp.where(hi_mask, wt[s:s + 1, :], 0.0)
        onehot_lo = (lo_iota == lo_s).astype(jnp.float32)            # (128, 128)
        acc_w = acc_w + lax.dot_general(a_w, onehot_lo, dn,
                                        preferred_element_type=jnp.float32)
        acc_wt = acc_wt + lax.dot_general(a_wt, onehot_lo, dn,
                                          preferred_element_type=jnp.float32)

    # hist[h, l] = histogram[h*128 + l]; rows 0:24 = w-weighted, 24:48 = wt-weighted
    out_ref[0, :N_HI, :] += acc_w
    out_ref[0, N_HI:, :] += acc_wt


def event_embed_pallas(events_padded, max_chunk=2048):
    """events_padded: (B, 4, N) float32 with +inf padding; returns (B, C, PH, PW)."""
    events_padded = events_padded.astype(jnp.float32)
    B, four, N = events_padded.shape
    assert four == 4

    # Chunk the event axis with large chunks (amortize ~600-cycle grid-step cost).
    n_round = ((N + 127) // 128) * 128
    if n_round <= max_chunk:
        n_chunk = max(n_round, 128)          # single chunk (full-extent block)
    else:
        n_chunk = max_chunk                  # multi-chunk: must be multiple of 1024
        assert n_chunk % 1024 == 0
    n_pad = ((N + n_chunk - 1) // n_chunk) * n_chunk
    if n_pad != N:
        pad = jnp.full((B, 4, n_pad - N), jnp.inf, dtype=jnp.float32)
        events_padded = jnp.concatenate([events_padded, pad], axis=-1)
    num_chunks = n_pad // n_chunk
    s_chunk = n_chunk // 128
    s_total = n_pad // 128

    # Hoist t0 / t_last (first & last valid timestamps; padding is trailing +inf).
    t = events_padded[:, 0, :]                               # (B, n_pad)
    n_valid = jnp.sum((t != jnp.inf).astype(jnp.int32), axis=-1)
    t0 = jnp.where(n_valid > 0, t[:, 0], 0.0)
    last_idx = jnp.maximum(n_valid - 1, 0)
    t_last = jnp.take_along_axis(t, last_idx[:, None], axis=1)[:, 0]
    t_last = jnp.where(n_valid > 0, t_last, 0.0)
    tparams = jnp.stack([t0, t_last], axis=-1).reshape(-1).astype(jnp.float32)  # (2B,)

    # Present the event axis sublane-dense: (B, 4, N) -> (B, 4, S, 128) (free reshape).
    ev4 = events_padded.reshape(B, 4, s_total, 128)

    hist = pl.pallas_call(
        event_token_kernel,
        out_shape=jax.ShapeDtypeStruct((B, 2 * N_HI, N_LO), jnp.float32),
        grid_spec=pltpu.PrefetchScalarGridSpec(
            num_scalar_prefetch=1,                  # tparams -> SMEM
            grid=(B, num_chunks),
            in_specs=[pl.BlockSpec((1, 4, s_chunk, 128),
                                   lambda b, k, tp: (b, 0, k, 0))],
            out_specs=pl.BlockSpec((1, 2 * N_HI, N_LO),
                                   lambda b, k, tp: (b, 0, 0)),
        ),
        compiler_params=pltpu.CompilerParams(
            dimension_semantics=("parallel", "arbitrary"),
            vmem_limit_bytes=32 * 1024 * 1024),
    )(tparams, ev4)

    # glue: (B, 48, 128) -> y[td, pol, {w,wt}, patch, token] -> (B, C, PH, PW)
    h = hist.reshape(B, 2, TIME_DIV, 2, PATCH_SIZE, TOKEN_NUM)
    y = jnp.transpose(h, (0, 2, 3, 1, 4, 5))   # (B, TD, pol, {w,wt}, PS, TN)
    return y.reshape(B, TIME_DIV * 2 * 2 * PATCH_SIZE, PH, PW)


# ------------------------- numpy reference (torch semantics) -------------------------
def ref_event_to_token(x):
    x = np.asarray(x, dtype=np.float32)
    y = np.zeros((TIME_DIV, 2, 2, PATCH_SIZE, TOKEN_NUM), dtype=np.float32)
    if len(x):
        w = (x[:, 3] != 2).astype(np.float64)
        wt = (1.0 - (x[:, 0] - x[0, 0]) / (x[-1, 0] - x[0, 0] + np.float32(1e-4))
              ).astype(np.float64)
        position = (np.floor(x[:, 1] / ((W - 1) / PW + EPS))
                    + np.floor(x[:, 2] / ((H - 1) / PH + EPS)) * PW)
        token = (np.floor(np.mod(x[:, 1], (W - 1) / PW + EPS))
                 + np.floor(np.mod(x[:, 2], (H - 1) / PH + EPS)) * int((W + 1) / PW))
        td = x[:, 0].astype(np.float64)
        dtime = np.floor(TIME_DIV * (td - td[0]) / (td[-1] - td[0] + 1.0))
        bins = np.array([TIME_DIV, 2, PATCH_SIZE, TOKEN_NUM])
        xnd = np.stack([dtime, x[:, 3], token, position], axis=0).astype(np.int64)
        xnd = np.minimum(np.maximum(xnd, 0), bins.reshape(-1, 1))
        index = np.array([2 * PATCH_SIZE * TOKEN_NUM, PATCH_SIZE * TOKEN_NUM,
                          TOKEN_NUM, 1])
        flat = np.sum(index.reshape(-1, 1) * xnd, axis=0)
        h1 = np.bincount(flat, weights=w, minlength=N_BINS).reshape(
            TIME_DIV, 2, PATCH_SIZE, TOKEN_NUM)
        h2 = np.bincount(flat, weights=wt, minlength=N_BINS).reshape(
            TIME_DIV, 2, PATCH_SIZE, TOKEN_NUM)
        y[:, :, 0, :, :] = h1
        y[:, :, 1, :, :] = h2
    return y.reshape(1, -1, PH, PW)


if __name__ == "__main__":
    def make_events(lengths, n_pad_seq, key):
        events_list = []
        for n in lengths:
            key, k1, k2, k3, k4 = jax.random.split(key, 5)
            t = jnp.sort(jax.random.randint(k1, (n,), 0, 200)).astype(jnp.float32)
            xc = jax.random.randint(k2, (n,), 0, W).astype(jnp.float32)
            yc = jax.random.randint(k3, (n,), 0, H).astype(jnp.float32)
            p = jax.random.randint(k4, (n,), 0, 2).astype(jnp.float32)
            events_list.append(jnp.stack([t, xc, yc, p], axis=1))   # (n, 4)
        b_sz = len(lengths)
        # pad_sequence(padding_value=inf).transpose(0, 1): batch-first (B, N_pad, 4)
        padded = jnp.full((b_sz, n_pad_seq, 4), jnp.inf, dtype=jnp.float32)
        for bi, e in enumerate(events_list):
            padded = padded.at[bi, : e.shape[0], :].set(e)
        # kernel wants (B, 4, N_pad) (fields outer, events inner)
        return events_list, jnp.transpose(padded, (0, 2, 1)), key

    key = jax.random.PRNGKey(0)

    # Test 1: small sequences -> single event chunk per batch row.
    ev_list, ev_kernel, key = make_events([600, 450], 640, key)
    out = jax.block_until_ready(event_embed_pallas(ev_kernel))
    ref = np.concatenate([ref_event_to_token(np.asarray(e)) for e in ev_list], axis=0)
    np.testing.assert_allclose(np.asarray(out), ref, rtol=1e-4, atol=1e-3)

    # Test 2: longer sequences -> exercises the multi-chunk accumulation path.
    ev_list2, ev_kernel2, key = make_events([1500, 1100], 1500, key)
    out2 = jax.block_until_ready(event_embed_pallas(ev_kernel2, max_chunk=1024))
    ref2 = np.concatenate([ref_event_to_token(np.asarray(e)) for e in ev_list2], axis=0)
    np.testing.assert_allclose(np.asarray(out2), ref2, rtol=1e-4, atol=1e-3)

    print("KERNEL_OK")
</pallas_src>

<mosaic_0001>
module attributes {stable_mosaic.version = 11 : i64} {
  func.func @event_token_kernel(%arg0: i32, %arg1: i32, %arg2: memref<4xf32, #tpu.memory_space<smem>>, %arg3: memref<1x4x5x128xf32, #tpu.memory_space<vmem>>, %arg4: memref<1x48x128xf32, #tpu.memory_space<vmem>>) attributes {dimension_semantics = [#tpu.dimension_semantics<parallel>, #tpu.dimension_semantics<arbitrary>], iteration_bounds = array<i64: 2, 1>, scalar_prefetch = 1 : i64, scratch_operands = 0 : i64, tpu.core_type = #tpu.core_type<tc>, window_params = [{transform_indices = @transform_0, window_bounds = array<i64: 1, 4, 5, 128>}, {transform_indices = @transform_1, window_bounds = array<i64: 1, 48, 128>}]} {
    %c0_i32 = arith.constant 0 : i32
    %0 = arith.cmpi eq, %arg1, %c0_i32 : i32
    %1 = arith.extui %0 : i1 to i32
    %c0_i32_0 = arith.constant 0 : i32
    %2 = arith.cmpi ne, %1, %c0_i32_0 : i32
    scf.if %2 {
      %cst_66 = arith.constant 0.000000e+00 : f32
      %250 = vector.broadcast %cst_66 : f32 to vector<1x48x128xf32>
      %c0_67 = arith.constant 0 : index
      %c0_68 = arith.constant 0 : index
      %c0_69 = arith.constant 0 : index
      %251 = vector.load %arg4[%c0_67, %c0_68, %c0_69] : memref<1x48x128xf32, #tpu.memory_space<vmem>>, vector<1x48x128xf32>
      tpu.vector_store %arg4[%c0_67, %c0_68, %c0_69], %250 {strides = array<i32>} : memref<1x48x128xf32, #tpu.memory_space<vmem>>, vector<1x48x128xf32>,
    } else {
    }
    %c0 = arith.constant 0 : index
    %c0_1 = arith.constant 0 : index
    %c0_2 = arith.constant 0 : index
    %c0_3 = arith.constant 0 : index
    %3 = vector.load %arg3[%c0, %c0_1, %c0_2, %c0_3] : memref<1x4x5x128xf32, #tpu.memory_space<vmem>>, vector<1x4x5x128xf32>
    %4 = vector.shape_cast %3 : vector<1x4x5x128xf32> to vector<4x5x128xf32>
    %5 = vector.extract_strided_slice %4 {offsets = [0, 0, 0], sizes = [1, 5, 128], strides = [1, 1, 1]} : vector<4x5x128xf32> to vector<1x5x128xf32>
    %6 = vector.shape_cast %5 : vector<1x5x128xf32> to vector<5x128xf32>
    %7 = vector.extract_strided_slice %4 {offsets = [1, 0, 0], sizes = [1, 5, 128], strides = [1, 1, 1]} : vector<4x5x128xf32> to vector<1x5x128xf32>
    %8 = vector.shape_cast %7 : vector<1x5x128xf32> to vector<5x128xf32>
    %9 = vector.extract_strided_slice %4 {offsets = [2, 0, 0], sizes = [1, 5, 128], strides = [1, 1, 1]} : vector<4x5x128xf32> to vector<1x5x128xf32>
    %10 = vector.shape_cast %9 : vector<1x5x128xf32> to vector<5x128xf32>
    %11 = vector.extract_strided_slice %4 {offsets = [3, 0, 0], sizes = [1, 5, 128], strides = [1, 1, 1]} : vector<4x5x128xf32> to vector<1x5x128xf32>
    %12 = vector.shape_cast %11 : vector<1x5x128xf32> to vector<5x128xf32>
    %c2_i32 = arith.constant 2 : i32
    %13 = arith.muli %c2_i32, %arg0 : i32
    %14 = arith.index_cast %13 : i32 to index
    %15 = memref.load %arg2[%14] : memref<4xf32, #tpu.memory_space<smem>>
    %c2_i32_4 = arith.constant 2 : i32
    %16 = arith.muli %c2_i32_4, %arg0 : i32
    %c1_i32 = arith.constant 1 : i32
    %17 = arith.addi %16, %c1_i32 : i32
    %18 = arith.index_cast %17 : i32 to index
    %19 = memref.load %arg2[%18] : memref<4xf32, #tpu.memory_space<smem>>
    %cst = arith.constant 0x7F800000 : f32
    %20 = vector.broadcast %cst : f32 to vector<5x128xf32>
    %21 = arith.cmpf one, %6, %20 : vector<5x128xf32>
    %cst_5 = arith.constant 0.000000e+00 : f32
    %22 = vector.broadcast %cst_5 : f32 to vector<5x128xf32>
    %23 = arith.select %21, %6, %22 : vector<5x128xi1>, vector<5x128xf32>
    %cst_6 = arith.constant 2.000000e+00 : f32
    %24 = vector.broadcast %cst_6 : f32 to vector<5x128xf32>
    %25 = arith.cmpf one, %12, %24 : vector<5x128xf32>
    %26 = arith.andi %21, %25 : vector<5x128xi1>
    %cst_7 = arith.constant 1.000000e+00 : f32
    %cst_8 = arith.constant 0.000000e+00 : f32
    %27 = vector.broadcast %cst_7 : f32 to vector<5x128xf32>
    %28 = vector.broadcast %cst_8 : f32 to vector<5x128xf32>
    %29 = arith.select %26, %27, %28 : vector<5x128xi1>, vector<5x128xf32>
    %30 = vector.broadcast %15 : f32 to vector<5x128xf32>
    %31 = arith.subf %23, %30 : vector<5x128xf32>
    %32 = arith.subf %19, %15 : f32
    %cst_9 = arith.constant 9.99999974E-5 : f32
    %33 = arith.addf %32, %cst_9 : f32
    %34 = vector.broadcast %33 : f32 to vector<5x128xf32>
    %35 = arith.divf %31, %34 : vector<5x128xf32>
    %cst_10 = arith.constant 1.000000e+00 : f32
    %36 = vector.broadcast %cst_10 : f32 to vector<5x128xf32>
    %37 = arith.subf %36, %35 : vector<5x128xf32>
    %cst_11 = arith.constant 0.000000e+00 : f32
    %38 = vector.broadcast %cst_11 : f32 to vector<5x128xf32>
    %39 = arith.select %21, %37, %38 : vector<5x128xi1>, vector<5x128xf32>
    %40 = vector.broadcast %15 : f32 to vector<5x128xf32>
    %41 = arith.subf %23, %40 : vector<5x128xf32>
    %cst_12 = arith.constant 6.000000e+00 : f32
    %42 = vector.broadcast %cst_12 : f32 to vector<5x128xf32>
    %43 = arith.mulf %42, %41 : vector<5x128xf32>
    %44 = arith.subf %19, %15 : f32
    %cst_13 = arith.constant 1.000000e+00 : f32
    %45 = arith.addf %44, %cst_13 : f32
    %46 = vector.broadcast %45 : f32 to vector<5x128xf32>
    %47 = arith.divf %43, %46 : vector<5x128xf32>
    %48 = math.floor %47 : vector<5x128xf32>
    %cst_14 = arith.constant 3.750100e+00 : f32
    %49 = vector.broadcast %cst_14 : f32 to vector<5x128xf32>
    %50 = arith.divf %8, %49 : vector<5x128xf32>
    %51 = math.floor %50 : vector<5x128xf32>
    %cst_15 = arith.constant 3.750100e+00 : f32
    %52 = vector.broadcast %cst_15 : f32 to vector<5x128xf32>
    %53 = arith.divf %10, %52 : vector<5x128xf32>
    %54 = math.floor %53 : vector<5x128xf32>
    %cst_16 = arith.constant 4.000000e+00 : f32
    %55 = vector.broadcast %cst_16 : f32 to vector<5x128xf32>
    %56 = arith.mulf %54, %55 : vector<5x128xf32>
    %57 = arith.addf %51, %56 : vector<5x128xf32>
    %cst_17 = arith.constant 3.750100e+00 : f32
    %58 = vector.broadcast %cst_17 : f32 to vector<5x128xf32>
    %59 = arith.remf %8, %58 : vector<5x128xf32>
    %cst_18 = arith.constant 0.000000e+00 : f32
    %60 = vector.broadcast %cst_18 : f32 to vector<5x128xf32>
    %61 = arith.cmpf one, %59, %60 : vector<5x128xf32>
    %cst_19 = arith.constant 0.000000e+00 : f32
    %62 = vector.broadcast %cst_19 : f32 to vector<5x128xf32>
    %63 = arith.cmpf olt, %59, %62 : vector<5x128xf32>
    %cst_20 = arith.constant 0.000000e+00 : f32
    %64 = arith.cmpf olt, %cst_17, %cst_20 : f32
    %65 = vector.broadcast %64 : i1 to vector<5x128xi1>
    %66 = vector.broadcast %65 : vector<5x128xi1> to vector<5x128xi1>
    %67 = arith.xori %63, %66 : vector<5x128xi1>
    %68 = arith.andi %67, %61 : vector<5x128xi1>
    %69 = vector.broadcast %cst_17 : f32 to vector<5x128xf32>
    %70 = arith.addf %59, %69 : vector<5x128xf32>
    %71 = arith.select %68, %70, %59 : vector<5x128xi1>, vector<5x128xf32>
    %72 = math.floor %71 : vector<5x128xf32>
    %cst_21 = arith.constant 3.750100e+00 : f32
    %73 = vector.broadcast %cst_21 : f32 to vector<5x128xf32>
    %74 = arith.remf %10, %73 : vector<5x128xf32>
    %cst_22 = arith.constant 0.000000e+00 : f32
    %75 = vector.broadcast %cst_22 : f32 to vector<5x128xf32>
    %76 = arith.cmpf one, %74, %75 : vector<5x128xf32>
    %cst_23 = arith.constant 0.000000e+00 : f32
    %77 = vector.broadcast %cst_23 : f32 to vector<5x128xf32>
    %78 = arith.cmpf olt, %74, %77 : vector<5x128xf32>
    %cst_24 = arith.constant 0.000000e+00 : f32
    %79 = arith.cmpf olt, %cst_21, %cst_24 : f32
    %80 = vector.broadcast %79 : i1 to vector<5x128xi1>
    %81 = vector.broadcast %80 : vector<5x128xi1> to vector<5x128xi1>
    %82 = arith.xori %78, %81 : vector<5x128xi1>
    %83 = arith.andi %82, %76 : vector<5x128xi1>
    %84 = vector.broadcast %cst_21 : f32 to vector<5x128xf32>
    %85 = arith.addf %74, %84 : vector<5x128xf32>
    %86 = arith.select %83, %85, %74 : vector<5x128xi1>, vector<5x128xf32>
    %87 = math.floor %86 : vector<5x128xf32>
    %cst_25 = arith.constant 4.000000e+00 : f32
    %88 = vector.broadcast %cst_25 : f32 to vector<5x128xf32>
    %89 = arith.mulf %87, %88 : vector<5x128xf32>
    %90 = arith.addf %72, %89 : vector<5x128xf32>
    %91 = arith.fptosi %48 : vector<5x128xf32> to vector<5x128xi32>
    %c0_i32_26 = arith.constant 0 : i32
    %92 = vector.broadcast %c0_i32_26 : i32 to vector<5x128xi32>
    %93 = arith.maxsi %91, %92 : vector<5x128xi32>
    %c6_i32 = arith.constant 6 : i32
    %94 = vector.broadcast %c6_i32 : i32 to vector<5x128xi32>
    %95 = arith.minsi %93, %94 : vector<5x128xi32>
    %96 = arith.fptosi %12 : vector<5x128xf32> to vector<5x128xi32>
    %c0_i32_27 = arith.constant 0 : i32
    %97 = vector.broadcast %c0_i32_27 : i32 to vector<5x128xi32>
    %98 = arith.maxsi %96, %97 : vector<5x128xi32>
    %c2_i32_28 = arith.constant 2 : i32
    %99 = vector.broadcast %c2_i32_28 : i32 to vector<5x128xi32>
    %100 = arith.minsi %98, %99 : vector<5x128xi32>
    %101 = arith.fptosi %90 : vector<5x128xf32> to vector<5x128xi32>
    %c0_i32_29 = arith.constant 0 : i32
    %102 = vector.broadcast %c0_i32_29 : i32 to vector<5x128xi32>
    %103 = arith.maxsi %101, %102 : vector<5x128xi32>
    %c16_i32 = arith.constant 16 : i32
    %104 = vector.broadcast %c16_i32 : i32 to vector<5x128xi32>
    %105 = arith.minsi %103, %104 : vector<5x128xi32>
    %106 = arith.fptosi %57 : vector<5x128xf32> to vector<5x128xi32>
    %c0_i32_30 = arith.constant 0 : i32
    %107 = vector.broadcast %c0_i32_30 : i32 to vector<5x128xi32>
    %108 = arith.maxsi %106, %107 : vector<5x128xi32>
    %c16_i32_31 = arith.constant 16 : i32
    %109 = vector.broadcast %c16_i32_31 : i32 to vector<5x128xi32>
    %110 = arith.minsi %108, %109 : vector<5x128xi32>
    %c512_i32 = arith.constant 512 : i32
    %111 = vector.broadcast %c512_i32 : i32 to vector<5x128xi32>
    %112 = arith.muli %95, %111 : vector<5x128xi32>
    %c256_i32 = arith.constant 256 : i32
    %113 = vector.broadcast %c256_i32 : i32 to vector<5x128xi32>
    %114 = arith.muli %100, %113 : vector<5x128xi32>
    %115 = arith.addi %112, %114 : vector<5x128xi32>
    %c16_i32_32 = arith.constant 16 : i32
    %116 = vector.broadcast %c16_i32_32 : i32 to vector<5x128xi32>
    %117 = arith.muli %105, %116 : vector<5x128xi32>
    %118 = arith.addi %115, %117 : vector<5x128xi32>
    %119 = arith.addi %118, %110 : vector<5x128xi32>
    %c7_i32 = arith.constant 7 : i32
    %120 = vector.broadcast %c7_i32 : i32 to vector<5x128xi32>
    %121 = arith.shrsi %119, %120 : vector<5x128xi32>
    %c127_i32 = arith.constant 127 : i32
    %122 = vector.broadcast %c127_i32 : i32 to vector<5x128xi32>
    %123 = arith.andi %119, %122 : vector<5x128xi32>
    %124 = tpu.iota {dimensions = array<i32: 0>} : vector<24x128xi32>
    %125 = tpu.iota {dimensions = array<i32: 0>} : vector<128x128xi32>
    %cst_33 = arith.constant 0.000000e+00 : f32
    %126 = vector.broadcast %cst_33 : f32 to vector<24x128xf32>
    %cst_34 = arith.constant 0.000000e+00 : f32
    %127 = vector.broadcast %cst_34 : f32 to vector<24x128xf32>
    %128 = vector.extract_strided_slice %121 {offsets = [0, 0], sizes = [1, 128], strides = [1, 1]} : vector<5x128xi32> to vector<1x128xi32>
    %129 = vector.extract_strided_slice %123 {offsets = [0, 0], sizes = [1, 128], strides = [1, 1]} : vector<5x128xi32> to vector<1x128xi32>
    %130 = vector.broadcast %128 : vector<1x128xi32> to vector<24x128xi32>
    %131 = arith.cmpi eq, %124, %130 : vector<24x128xi32>
    %132 = vector.extract_strided_slice %29 {offsets = [0, 0], sizes = [1, 128], strides = [1, 1]} : vector<5x128xf32> to vector<1x128xf32>
    %cst_35 = arith.constant 0.000000e+00 : f32
    %133 = vector.shape_cast %132 : vector<1x128xf32> to vector<1x128xf32>
    %134 = vector.broadcast %133 : vector<1x128xf32> to vector<24x128xf32>
    %135 = vector.broadcast %cst_35 : f32 to vector<24x128xf32>
    %136 = arith.select %131, %134, %135 : vector<24x128xi1>, vector<24x128xf32>
    %137 = vector.extract_strided_slice %39 {offsets = [0, 0], sizes = [1, 128], strides = [1, 1]} : vector<5x128xf32> to vector<1x128xf32>
    %cst_36 = arith.constant 0.000000e+00 : f32
    %138 = vector.shape_cast %137 : vector<1x128xf32> to vector<1x128xf32>
    %139 = vector.broadcast %138 : vector<1x128xf32> to vector<24x128xf32>
    %140 = vector.broadcast %cst_36 : f32 to vector<24x128xf32>
    %141 = arith.select %131, %139, %140 : vector<24x128xi1>, vector<24x128xf32>
    %142 = vector.broadcast %129 : vector<1x128xi32> to vector<128x128xi32>
    %143 = arith.cmpi eq, %125, %142 : vector<128x128xi32>
    %144 = arith.extui %143 : vector<128x128xi1> to vector<128x128xi32>
    %145 = arith.sitofp %144 : vector<128x128xi32> to vector<128x128xf32>
    %cst_37 = arith.constant dense<0.000000e+00> : vector<24x128xf32>
    %146 = tpu.matmul %136, %145, %cst_37 {dimension_numbers = #tpu.dot_dimension_numbers<[1], [1], [0], [0], [0, 0, 1, 0], [], []>} : vector<24x128xf32>, vector<128x128xf32>, vector<24x128xf32> -> vector<24x128xf32>
    %147 = arith.addf %126, %146 : vector<24x128xf32>
    %cst_38 = arith.constant dense<0.000000e+00> : vector<24x128xf32>
    %148 = tpu.matmul %141, %145, %cst_38 {dimension_numbers = #tpu.dot_dimension_numbers<[1], [1], [0], [0], [0, 0, 1, 0], [], []>} : vector<24x128xf32>, vector<128x128xf32>, vector<24x128xf32> -> vector<24x128xf32>
    %149 = arith.addf %127, %148 : vector<24x128xf32>
    %150 = vector.extract_strided_slice %121 {offsets = [1, 0], sizes = [1, 128], strides = [1, 1]} : vector<5x128xi32> to vector<1x128xi32>
    %151 = vector.extract_strided_slice %123 {offsets = [1, 0], sizes = [1, 128], strides = [1, 1]} : vector<5x128xi32> to vector<1x128xi32>
    %152 = vector.broadcast %150 : vector<1x128xi32> to vector<24x128xi32>
    %153 = arith.cmpi eq, %124, %152 : vector<24x128xi32>
    %154 = vector.extract_strided_slice %29 {offsets = [1, 0], sizes = [1, 128], strides = [1, 1]} : vector<5x128xf32> to vector<1x128xf32>
    %cst_39 = arith.constant 0.000000e+00 : f32
    %155 = vector.shape_cast %154 : vector<1x128xf32> to vector<1x128xf32>
    %156 = vector.broadcast %155 : vector<1x128xf32> to vector<24x128xf32>
    %157 = vector.broadcast %cst_39 : f32 to vector<24x128xf32>
    %158 = arith.select %153, %156, %157 : vector<24x128xi1>, vector<24x128xf32>
    %159 = vector.extract_strided_slice %39 {offsets = [1, 0], sizes = [1, 128], strides = [1, 1]} : vector<5x128xf32> to vector<1x128xf32>
    %cst_40 = arith.constant 0.000000e+00 : f32
    %160 = vector.shape_cast %159 : vector<1x128xf32> to vector<1x128xf32>
    %161 = vector.broadcast %160 : vector<1x128xf32> to vector<24x128xf32>
    %162 = vector.broadcast %cst_40 : f32 to vector<24x128xf32>
    %163 = arith.select %153, %161, %162 : vector<24x128xi1>, vector<24x128xf32>
    %164 = vector.broadcast %151 : vector<1x128xi32> to vector<128x128xi32>
    %165 = arith.cmpi eq, %125, %164 : vector<128x128xi32>
    %166 = arith.extui %165 : vector<128x128xi1> to vector<128x128xi32>
    %167 = arith.sitofp %166 : vector<128x128xi32> to vector<128x128xf32>
    %cst_41 = arith.constant dense<0.000000e+00> : vector<24x128xf32>
    %168 = tpu.matmul %158, %167, %cst_41 {dimension_numbers = #tpu.dot_dimension_numbers<[1], [1], [0], [0], [0, 0, 1, 0], [], []>} : vector<24x128xf32>, vector<128x128xf32>, vector<24x128xf32> -> vector<24x128xf32>
    %169 = arith.addf %147, %168 : vector<24x128xf32>
    %cst_42 = arith.constant dense<0.000000e+00> : vector<24x128xf32>
    %170 = tpu.matmul %163, %167, %cst_42 {dimension_numbers = #tpu.dot_dimension_numbers<[1], [1], [0], [0], [0, 0, 1, 0], [], []>} : vector<24x128xf32>, vector<128x128xf32>, vector<24x128xf32> -> vector<24x128xf32>
    %171 = arith.addf %149, %170 : vector<24x128xf32>
    %172 = vector.extract_strided_slice %121 {offsets = [2, 0], sizes = [1, 128], strides = [1, 1]} : vector<5x128xi32> to vector<1x128xi32>
    %173 = vector.extract_strided_slice %123 {offsets = [2, 0], sizes = [1, 128], strides = [1, 1]} : vector<5x128xi32> to vector<1x128xi32>
    %174 = vector.broadcast %172 : vector<1x128xi32> to vector<24x128xi32>
    %175 = arith.cmpi eq, %124, %174 : vector<24x128xi32>
    %176 = vector.extract_strided_slice %29 {offsets = [2, 0], sizes = [1, 128], strides = [1, 1]} : vector<5x128xf32> to vector<1x128xf32>
    %cst_43 = arith.constant 0.000000e+00 : f32
    %177 = vector.shape_cast %176 : vector<1x128xf32> to vector<1x128xf32>
    %178 = vector.broadcast %177 : vector<1x128xf32> to vector<24x128xf32>
    %179 = vector.broadcast %cst_43 : f32 to vector<24x128xf32>
    %180 = arith.select %175, %178, %179 : vector<24x128xi1>, vector<24x128xf32>
    %181 = vector.extract_strided_slice %39 {offsets = [2, 0], sizes = [1, 128], strides = [1, 1]} : vector<5x128xf32> to vector<1x128xf32>
    %cst_44 = arith.constant 0.000000e+00 : f32
    %182 = vector.shape_cast %181 : vector<1x128xf32> to vector<1x128xf32>
    %183 = vector.broadcast %182 : vector<1x128xf32> to vector<24x128xf32>
    %184 = vector.broadcast %cst_44 : f32 to vector<24x128xf32>
    %185 = arith.select %175, %183, %184 : vector<24x128xi1>, vector<24x128xf32>
    %186 = vector.broadcast %173 : vector<1x128xi32> to vector<128x128xi32>
    %187 = arith.cmpi eq, %125, %186 : vector<128x128xi32>
    %188 = arith.extui %187 : vector<128x128xi1> to vector<128x128xi32>
    %189 = arith.sitofp %188 : vector<128x128xi32> to vector<128x128xf32>
    %cst_45 = arith.constant dense<0.000000e+00> : vector<24x128xf32>
    %190 = tpu.matmul %180, %189, %cst_45 {dimension_numbers = #tpu.dot_dimension_numbers<[1], [1], [0], [0], [0, 0, 1, 0], [], []>} : vector<24x128xf32>, vector<128x128xf32>, vector<24x128xf32> -> vector<24x128xf32>
    %191 = arith.addf %169, %190 : vector<24x128xf32>
    %cst_46 = arith.constant dense<0.000000e+00> : vector<24x128xf32>
    %192 = tpu.matmul %185, %189, %cst_46 {dimension_numbers = #tpu.dot_dimension_numbers<[1], [1], [0], [0], [0, 0, 1, 0], [], []>} : vector<24x128xf32>, vector<128x128xf32>, vector<24x128xf32> -> vector<24x128xf32>
    %193 = arith.addf %171, %192 : vector<24x128xf32>
    %194 = vector.extract_strided_slice %121 {offsets = [3, 0], sizes = [1, 128], strides = [1, 1]} : vector<5x128xi32> to vector<1x128xi32>
    %195 = vector.extract_strided_slice %123 {offsets = [3, 0], sizes = [1, 128], strides = [1, 1]} : vector<5x128xi32> to vector<1x128xi32>
    %196 = vector.broadcast %194 : vector<1x128xi32> to vector<24x128xi32>
    %197 = arith.cmpi eq, %124, %196 : vector<24x128xi32>
    %198 = vector.extract_strided_slice %29 {offsets = [3, 0], sizes = [1, 128], strides = [1, 1]} : vector<5x128xf32> to vector<1x128xf32>
    %cst_47 = arith.constant 0.000000e+00 : f32
    %199 = vector.shape_cast %198 : vector<1x128xf32> to vector<1x128xf32>
    %200 = vector.broadcast %199 : vector<1x128xf32> to vector<24x128xf32>
    %201 = vector.broadcast %cst_47 : f32 to vector<24x128xf32>
    %202 = arith.select %197, %200, %201 : vector<24x128xi1>, vector<24x128xf32>
    %203 = vector.extract_strided_slice %39 {offsets = [3, 0], sizes = [1, 128], strides = [1, 1]} : vector<5x128xf32> to vector<1x128xf32>
    %cst_48 = arith.constant 0.000000e+00 : f32
    %204 = vector.shape_cast %203 : vector<1x128xf32> to vector<1x128xf32>
    %205 = vector.broadcast %204 : vector<1x128xf32> to vector<24x128xf32>
    %206 = vector.broadcast %cst_48 : f32 to vector<24x128xf32>
    %207 = arith.select %197, %205, %206 : vector<24x128xi1>, vector<24x128xf32>
    %208 = vector.broadcast %195 : vector<1x128xi32> to vector<128x128xi32>
    %209 = arith.cmpi eq, %125, %208 : vector<128x128xi32>
    %210 = arith.extui %209 : vector<128x128xi1> to vector<128x128xi32>
    %211 = arith.sitofp %210 : vector<128x128xi32> to vector<128x128xf32>
    %cst_49 = arith.constant dense<0.000000e+00> : vector<24x128xf32>
    %212 = tpu.matmul %202, %211, %cst_49 {dimension_numbers = #tpu.dot_dimension_numbers<[1], [1], [0], [0], [0, 0, 1, 0], [], []>} : vector<24x128xf32>, vector<128x128xf32>, vector<24x128xf32> -> vector<24x128xf32>
    %213 = arith.addf %191, %212 : vector<24x128xf32>
    %cst_50 = arith.constant dense<0.000000e+00> : vector<24x128xf32>
    %214 = tpu.matmul %207, %211, %cst_50 {dimension_numbers = #tpu.dot_dimension_numbers<[1], [1], [0], [0], [0, 0, 1, 0], [], []>} : vector<24x128xf32>, vector<128x128xf32>, vector<24x128xf32> -> vector<24x128xf32>
    %215 = arith.addf %193, %214 : vector<24x128xf32>
    %216 = vector.extract_strided_slice %121 {offsets = [4, 0], sizes = [1, 128], strides = [1, 1]} : vector<5x128xi32> to vector<1x128xi32>
    %217 = vector.extract_strided_slice %123 {offsets = [4, 0], sizes = [1, 128], strides = [1, 1]} : vector<5x128xi32> to vector<1x128xi32>
    %218 = vector.broadcast %216 : vector<1x128xi32> to vector<24x128xi32>
    %219 = arith.cmpi eq, %124, %218 : vector<24x128xi32>
    %220 = vector.extract_strided_slice %29 {offsets = [4, 0], sizes = [1, 128], strides = [1, 1]} : vector<5x128xf32> to vector<1x128xf32>
    %cst_51 = arith.constant 0.000000e+00 : f32
    %221 = vector.shape_cast %220 : vector<1x128xf32> to vector<1x128xf32>
    %222 = vector.broadcast %221 : vector<1x128xf32> to vector<24x128xf32>
    %223 = vector.broadcast %cst_51 : f32 to vector<24x128xf32>
    %224 = arith.select %219, %222, %223 : vector<24x128xi1>, vector<24x128xf32>
    %225 = vector.extract_strided_slice %39 {offsets = [4, 0], sizes = [1, 128], strides = [1, 1]} : vector<5x128xf32> to vector<1x128xf32>
    %cst_52 = arith.constant 0.000000e+00 : f32
    %226 = vector.shape_cast %225 : vector<1x128xf32> to vector<1x128xf32>
    %227 = vector.broadcast %226 : vector<1x128xf32> to vector<24x128xf32>
    %228 = vector.broadcast %cst_52 : f32 to vector<24x128xf32>
    %229 = arith.select %219, %227, %228 : vector<24x128xi1>, vector<24x128xf32>
    %230 = vector.broadcast %217 : vector<1x128xi32> to vector<128x128xi32>
    %231 = arith.cmpi eq, %125, %230 : vector<128x128xi32>
    %232 = arith.extui %231 : vector<128x128xi1> to vector<128x128xi32>
    %233 = arith.sitofp %232 : vector<128x128xi32> to vector<128x128xf32>
    %cst_53 = arith.constant dense<0.000000e+00> : vector<24x128xf32>
    %234 = tpu.matmul %224, %233, %cst_53 {dimension_numbers = #tpu.dot_dimension_numbers<[1], [1], [0], [0], [0, 0, 1, 0], [], []>} : vector<24x128xf32>, vector<128x128xf32>, vector<24x128xf32> -> vector<24x128xf32>
    %235 = arith.addf %213, %234 : vector<24x128xf32>
    %cst_54 = arith.constant dense<0.000000e+00> : vector<24x128xf32>
    %236 = tpu.matmul %229, %233, %cst_54 {dimension_numbers = #tpu.dot_dimension_numbers<[1], [1], [0], [0], [0, 0, 1, 0], [], []>} : vector<24x128xf32>, vector<128x128xf32>, vector<24x128xf32> -> vector<24x128xf32>
    %237 = arith.addf %215, %236 : vector<24x128xf32>
    %c0_55 = arith.constant 0 : index
    %c0_56 = arith.constant 0 : index
    %c0_57 = arith.constant 0 : index
    %238 = vector.load %arg4[%c0_55, %c0_56, %c0_57] : memref<1x48x128xf32, #tpu.memory_space<vmem>>, vector<1x24x128xf32>
    %239 = vector.shape_cast %238 : vector<1x24x128xf32> to vector<24x128xf32>
    %240 = arith.addf %239, %235 : vector<24x128xf32>
    %c0_58 = arith.constant 0 : index
    %c0_59 = arith.constant 0 : index
    %c0_60 = arith.constant 0 : index
    %241 = vector.load %arg4[%c0_58, %c0_59, %c0_60] : memref<1x48x128xf32, #tpu.memory_space<vmem>>, vector<1x24x128xf32>
    %242 = vector.shape_cast %241 : vector<1x24x128xf32> to vector<24x128xf32>
    %243 = vector.shape_cast %240 : vector<24x128xf32> to vector<1x24x128xf32>
    tpu.vector_store %arg4[%c0_58, %c0_59, %c0_60], %243 {strides = array<i32>} : memref<1x48x128xf32, #tpu.memory_space<vmem>>, vector<1x24x128xf32>,
    %c0_61 = arith.constant 0 : index
    %c24 = arith.constant 24 : index
    %c0_62 = arith.constant 0 : index
    %244 = vector.load %arg4[%c0_61, %c24, %c0_62] : memref<1x48x128xf32, #tpu.memory_space<vmem>>, vector<1x24x128xf32>
    %245 = vector.shape_cast %244 : vector<1x24x128xf32> to vector<24x128xf32>
    %246 = arith.addf %245, %237 : vector<24x128xf32>
    %c0_63 = arith.constant 0 : index
    %c24_64 = arith.constant 24 : index
    %c0_65 = arith.constant 0 : index
    %247 = vector.load %arg4[%c0_63, %c24_64, %c0_65] : memref<1x48x128xf32, #tpu.memory_space<vmem>>, vector<1x24x128xf32>
    %248 = vector.shape_cast %247 : vector<1x24x128xf32> to vector<24x128xf32>
    %249 = vector.shape_cast %246 : vector<24x128xf32> to vector<1x24x128xf32>
    tpu.vector_store %arg4[%c0_63, %c24_64, %c0_65], %249 {strides = array<i32>} : memref<1x48x128xf32, #tpu.memory_space<vmem>>, vector<1x24x128xf32>,
    return
  }
  func.func @transform_0(%arg0: i32, %arg1: i32, %arg2: memref<4xf32, #tpu.memory_space<smem>>) -> (i32, i32, i32, i32) {
    %c0_i32 = arith.constant 0 : i32
    %c0_i32_0 = arith.constant 0 : i32
    %c0_i32_1 = arith.constant 0 : i32
    return %arg0, %c0_i32, %arg1, %c0_i32_0 : i32, i32, i32, i32
  }
  func.func @transform_1(%arg0: i32, %arg1: i32, %arg2: memref<4xf32, #tpu.memory_space<smem>>) -> (i32, i32, i32) {
    %c0_i32 = arith.constant 0 : i32
    %c0_i32_0 = arith.constant 0 : i32
    %c0_i32_1 = arith.constant 0 : i32
    return %arg0, %c0_i32, %c0_i32_0 : i32, i32, i32
  }
}

</mosaic_0001>

<bundles_post_ra>
// kernel: tpu_custom_call.1
= control target key start
LH: loop header
LB: loop body
LE: loop exit
PB: predicated region body
PF: predicated region fallthrough
CT: control target
= control target key end

     0   :  { %s3706_s0 = inlined_call_operand.vmem [shape: f32[4], index: 0, kind: input, shape index: {}]   ;;  %s3707_s1 = inlined_call_operand.vmem [shape: f32[2,4,5,128], index: 1, kind: input, shape index: {}]   ;;  %s3708_s2 = inlined_call_operand.hbm [shape: f32[2,48,128], index: 2, kind: output, shape index: {}]  }
   0x1   :  { %s7_s11 = sshll.u32 %s3706_s0, 4  ;;  %s8_s11 = int_to_ptr.vmem [resolvable:$true] %s7_s11 }
   0x2   :  { %s2519_s12 = scalar_lea.vmem %s8_s11, 16  ;;  %p2524_p1 = scmp.lt.s32.totalorder %s8_s11, %s8_s11 }
   0x3   :  { %p2520_p0 = scmp.ne.s32.totalorder %s8_s11, %s2519_s12  ;;  %p2525_p2 = scmp.lt.s32.totalorder %s2519_s12, %s2519_s12 }
   0x5   :  { %p2526_p3 = por %p2525_p2, %p2524_p1 }
   0x7   :  { %p2527_p4 = pnand %p2526_p3, %p2520_p0 }
   0x9   :  { %2530 = shalt.err (!%p2527_p4)  }
   0xa   :  { %s2611_s13 = smov [#allocation3]  }
   0xb   :  { %10 = dma.vmem_to_smem %s8_s11, 16, %s2611_s13, [#allocation2] }
   0xc   :  { %2581 = dma.done.wait [#allocation2], 16 }
   0xd   :  { %2582 = vsyncadd [#allocation2], 4294967280 }
   0xe   :  { %12 = sfence }
   0xf   :  { %13 = vsyncpa [#allocation5], 0 }
  0x10   :  { %15 = vsyncpa [#allocation5 + $0x1], 0  ;;  %s2636_s14 = smov 0   ;;  %s2638_s15 = smov 0  }
  0x11   :  { %s2640_s0 = smov 0   ;;  %s2642_s16 = smov 0  }
  0x12   :  { %s2644_s17 = smov 0   ;;  %s2646_s18 = smov 0  }
  0x13 LB: > { %s1562_s19 = sadd.s32 4294967295, %s2609_s18   ;;  %s1563_s20 = sadd.s32 4294967294, %s2609_s18   ;;  %s2609_s18 = sphi %s2646_s18, %s21_s18   ;;  %s2605_s17 = sphi %s2644_s17, %s3759_s17   ;;  %s2601_s16 = sphi %s2642_s16, %s3758_s16   ;;  %s2597_s0 = sphi %s2640_s0, %s3757_s0   ;;  %s2593_s15 = sphi %s2638_s15, %s3756_s15   ;;  %s2589_s14 = sphi %s2636_s14, %s3755_s14  }
  0x14   : > { %s33_s21 = sadd.s32 1, %s2605_s17  ;;  %s68_s22 = sadd.s32 1, %s2597_s0 }
  0x15   : > { %p35_p5 = scmp.ge.s32.totalorder %s33_s21, 2  ;;  %p78_p6 = scmp.ne.s32.totalorder %s2597_s0, %s2593_s15 }
  0x16   : > { %p79_p7 = scmp.eq.s32.totalorder %s1562_s19, 1  ;;  %p84_p8 = scmp.ne.s32.totalorder %s2593_s15, %s2589_s14 }
  0x17   : > { %s3761_s21 = smov (%p35_p5, %s33_s21), 0  ;;  %p85_p10 = scmp.eq.s32.totalorder %s1563_s20, 1 }
  0x18   : > { %p2676_p9 = por %p79_p7, %p78_p6  ;;  %s65_s24 = ssub.s32 %s2605_s17, %s3761_s21 }
  0x19   : > { %p1566_p11 = scmp.ge.s32.totalorder %s2609_s18, 1  ;;  %p66_p12 = scmp.eq.s32.totalorder %s65_s24, 0 }
  0x1a   : > { %p2683_p13 = por %p85_p10, %p84_p8  ;;  %p114_p0 = scmp.lt.s32.totalorder %s2609_s18, 3 }
  0x1b   : > { %s2689_s26 = scalar_select %p66_p12, %s2597_s0, %s68_s22  }
  0x1c   : > { %p115_p1 = pnand %p1566_p11, %p114_p0 }
  0x1d   : > { %p137_p2 = scmp.lt.s32.totalorder (!%p115_p1), %s2601_s16, 1  ;;  %s1569_s27 = sshll.u32 (!%p115_p1), %s2601_s16, 1 }
  0x1e   : > { %118 = sbr.rel (%p115_p1) target bundleno = 621 (0x26d), region = 24  ;;  %s2695_s28 = sld [smem:[#allocation3 + %s1569_s27]] (!%p115_p1) }
  0x1f   : > { %s161_s29 = sadd.s32 (!%p115_p1), 1, %s1569_s27  ;;  %s134_s11 = sand.u32 (!%p115_p1), 1, %s2593_s15  }
  0x20   : > { %s162_s3 = sld [smem:[#allocation3 + %s161_s29]] (!%p115_p1)  ;;  %s2444_s12 = smul.u32 (!%p115_p1), 48, %s134_s11 }
  0x21   : > { %s2453_s19 = smul.u32 (!%p115_p1), 768, %s2601_s16  ;;  %s2615_s29 = smov (!%p115_p1), [#allocation4]  }
  0x22   : > { %s136_s13 = scalar_lea.vmem (!%p115_p1), [#allocation4], %s2444_s12 }
  0x23   : > { %v2612_v0 = vmov 0.0   ;;  %s138_s30 = scalar_select %p137_p2, %s2601_s16, 1  ;;  %vm2613_vm0 = vmmov 0   ;;  %v254_v60 = vlaneseq }
  0x24   : > { %2034 = vmatprep.subr.mxu0 %v2612_v0  ;;  %2075 = vmatprep.subr.mxu1 %v2612_v0  ;;  %v168_v17 = vstv %s2695_s28  ;;  %s1486_s20 = sshll.u32 %s136_s13, 4  ;;  %s3655_s27 = scalar_lea.hbm %s3708_s2, %s2453_s19  ;;  %s3657_s20 = int_to_ptr.vmem [resolvable:$true] %s1486_s20 }
  0x25   : > { %2066 = vmatprep.mubr.msk.f32.mxu0 %vm2613_vm0, %v2612_v0  ;;  %2107 = vmatprep.mubr.msk.f32.mxu1 %vm2613_vm0, %v2612_v0  ;;  %s1843_s4 = sshll.u32 %s138_s30, 5  ;;  %s3661_s16 = scalar_lea.sflag [#allocation5], %s134_s11 }
  0x26   : > { %s144_s7 = scalar_lea.vmem %s3707_s1, %s1843_s4  ;;  %s2706_s8 = ssub.f32 %s162_s3, %s2695_s28 }
  0x27   : > { %v156_v1 = vld [vmem:[%s144_s7 + $0x8] sm:$0x1f]  ;;  %v157_v2 = vld [vmem:[%s144_s7 + $0x10] sm:$0x1f]  ;;  %v2708_v5 = vld [vmem:[%s144_s7] sm:$0x1f] }
  0x28   : > { %v190_v3 = vand.u32 2147483647, %v156_v1  ;;  %v207_v4 = vand.u32 2147483647, %v157_v2  ;;  %v186_v6 = vmul.f32 0.26665956, %v157_v2 }
  0x29   : > { %s178_s9 = sadd.f32 1.0, %s2706_s8  ;;  %vm163_vm1 = vcmp.ne.f32.partialorder %v2708_v5, inf  ;;  %v184_v12 = vmul.f32 0.26665956, %v156_v1  ;;  %v158_v15 = vld [vmem:[%s144_s7 + $0x18] sm:$0x1f] }
  0x2a   : > { %v192_v7 = vmul.f32 0.26665956, %v190_v3  ;;  %v209_v8 = vmul.f32 0.26665956, %v207_v4  ;;  %v187_v13 = vfloor.f32 %v186_v6  ;;  %v164_v19 = vsel %vm163_vm1, %v2708_v5, 0.0  ;;  %s2531_s28 = scalar_lea.vmem %s3657_s20, 768 }
  0x2b   : > { %v179_v10 = vstv %s178_s9  ;;  %v199_v20 = vand.u32 2147483648, %v156_v1  ;;  %vm165_vm2 = vcmp.ne.f32.partialorder %v158_v15, 2.0  ;;  %v185_v22 = vfloor.f32 %v184_v12  ;;  %s171_s10 = sadd.f32 0.0001, %s2706_s8  ;;  %p2532_p3 = scmp.ne.s32.totalorder %s3657_s20, %s2531_s28 }
  0x2c   : > { %v193_v9 = vfloor.f32 %v192_v7  ;;  %v210_v11 = vfloor.f32 %v209_v8  ;;  %2515 = vrcp.f32 %v179_v10  ;;  %v188_v23 = vmul.f32 4.0, %v187_v13  ;;  %vm2718_vm4 = vmand %vm163_vm1, %vm165_vm2  ;;  %s2535_s30 = sshll.u32 %s2615_s29, 4  ;;  %s2536_s30 = int_to_ptr.vmem [resolvable:$false] %s2535_s30 }
  0x2d   : > { %v2447_v24 = vtrunc.f32 %v158_v15  ;;  %v216_v27 = vand.u32 2147483648, %v157_v2  ;;  %v169_v28 = vsub.f32 %v164_v19, %v168_v17  ;;  %v172_v50 = vstv %s171_s10  ;;  %p2533_p4 = pnand %p2532_p3, %p2676_p9  ;;  %s2537_s3 = scalar_lea.vmem %s2536_s30, 1536 }
  0x2e   : > { %v194_v14 = vmul.f32 3.7501, %v193_v9  ;;  %v211_v16 = vmul.f32 3.7501, %v210_v11  ;;  %v189_v32 = vadd.f32 %v188_v23, %v185_v22  ;;  %2517 = vrcp.f32 %v172_v50  ;;  %p2538_p6 = scmp.lt.s32.totalorder %s3657_s20, %s2536_s30  ;;  %p2539_p7 = scmp.lt.s32.totalorder %s2537_s3, %s2531_s28 }
  0x2f   : > { %v2448_v34 = vcvt.f32.s32 %v2447_v24  ;;  %v177_v36 = vmul.f32 6.0, %v169_v28  ;;  %v2614_v5 = vmov 1.0   ;;  %p2534_p5 = pneg %p2533_p4 }
  0x30   : > { %v195_v18 = vsub.f32 %v190_v3, %v194_v14  ;;  %v212_v21 = vsub.f32 %v207_v4, %v211_v16  ;;  %v2451_v40 = vtrunc.f32 %v189_v32  ;;  %v2723_v4 = vshrl.u32 %v254_v60, 7  ;;  %p2540_p8 = por %p2539_p7, %p2538_p6 }
  0x31   : > { %vm232_vm12 = vcmp.gt.s32.totalorder %v2448_v34, 0 }
  0x32   : > { %vm196_vm3 = vcmp.eq.f32.partialorder %v195_v18, 3.7501  ;;  %vm213_vm5 = vcmp.eq.f32.partialorder %v212_v21, 3.7501  ;;  %v233_v46 = vsel %vm232_vm12, %v2448_v34, 0  ;;  %v2452_v49 = vcvt.f32.s32 %v2451_v40  ;;  %p2541_p10 = pnand %p2540_p8, %p2534_p5 }
  0x33   : > { %v197_v26 = vsel %vm196_vm3, 0.0, %v195_v18  ;;  %v214_v30 = vsel %vm213_vm5, 0.0, %v212_v21  ;;  %vm234_vm13 = vcmp.lt.s32.totalorder %v233_v46, 2  ;;  %v2728_v11 = vsub.s32 1, %v2723_v4 }
  0x34   : > { %v198_v29 = vand.u32 2147483647, %v197_v26  ;;  %v215_v31 = vand.u32 2147483647, %v214_v30  ;;  %vm242_vm14 = vcmp.gt.s32.totalorder %v2452_v49, 0  ;;  %v235_v55 = vsel %vm234_vm13, %v233_v46, 2 }
  0x35   : > { %v243_v58 = vsel %vm242_vm14, %v2452_v49, 0  ;;  %v247_v59 = vmul.u32 256, %v235_v55  ;;  %v2731_v12 = vsub.s32 0, %v2723_v4  ;;  %v2737_v15 = vadd.s32 120, %v2723_v4 }
  0x36   : > { %v200_v33 = vor.u32 %v199_v20, %v198_v29  ;;  %v217_v35 = vor.u32 %v216_v27, %v215_v31  ;;  %v2752_v19 = vadd.s32 112, %v2723_v4  ;;  %v2773_v20 = vadd.s32 104, %v2723_v4 }
  0x37   : > { %v2790_v21 = vadd.s32 96, %v2723_v4  ;;  %v2807_v22 = vadd.s32 88, %v2723_v4  ;;  %v2824_v23 = vadd.s32 80, %v2723_v4  ;;  %v2841_v24 = vadd.s32 72, %v2723_v4 }
  0x38   : > { %vm201_vm6 = vcmp.ne.f32.partialorder %v200_v33, 0.0  ;;  %vm202_vm7 = vcmp.lt.f32.partialorder %v200_v33, 0.0  ;;  %v204_v37 = vadd.f32 3.7501, %v200_v33  ;;  %vm218_vm9 = vcmp.ne.f32.partialorder %v217_v35, 0.0 }
  0x39   : > { %vm203_vm8 = vmand %vm202_vm7, %vm201_vm6  ;;  %vm219_vm10 = vcmp.lt.f32.partialorder %v217_v35, 0.0  ;;  %v221_v38 = vadd.f32 3.7501, %v217_v35  ;;  %v2516_v41 = vpop.eup %2515  ;;  %vm244_vm6 = vcmp.lt.s32.totalorder %v243_v58, 16  ;;  %v2858_v26 = vadd.s32 64, %v2723_v4 }
  0x3a   : > { %v205_v39 = vsel %vm203_vm8, %v204_v37, %v200_v33  ;;  %vm220_vm11 = vmand %vm219_vm10, %vm218_vm9  ;;  %v181_v43 = vmul.f32 %v2516_v41, %v177_v36  ;;  %v245_v6 = vsel %vm244_vm6, %v243_v58, 16  ;;  %v2875_v27 = vadd.s32 56, %v2723_v4 }
  0x3b   : > { %v222_v42 = vsel %vm220_vm11, %v221_v38, %v217_v35  ;;  %v206_v44 = vfloor.f32 %v205_v39  ;;  %v2518_v7 = vpop.eup %2517  ;;  %v2909_v29 = vadd.s32 40, %v2723_v4  ;;  %v2926_v30 = vadd.s32 32, %v2723_v4 }
  0x3c   : > { %v223_v45 = vfloor.f32 %v222_v42  ;;  %v182_v47 = vfloor.f32 %v181_v43  ;;  %v174_v9 = vmul.f32 %v2518_v7, %v169_v28  ;;  %v2892_v28 = vadd.s32 48, %v2723_v4 }
  0x3d   : > { %v2943_v31 = vadd.s32 24, %v2723_v4  ;;  %v2960_v32 = vadd.s32 16, %v2723_v4  ;;  %v2977_v33 = vadd.s32 8, %v2723_v4  ;;  %v3007_v35 = vsel %vm2718_vm4, 1.0, %v2612_v0 }
  0x3e   : > { %v224_v48 = vmul.f32 4.0, %v223_v45  ;;  %v2445_v52 = vtrunc.f32 %v182_v47  ;;  %v175_v13 = vsub.f32 1.0, %v174_v9  ;;  %v354_v25 = vrot.slane %v3007_v35, %v2728_v11 }
  0x3f   : > { %v281_v38 = vrot.slane %v3007_v35, %v2731_v12  ;;  %v3220_v39 = vsub.s32 2, %v2723_v4  ;;  %v3367_v43 = vsub.s32 3, %v2723_v4 }
  0x40   : > { %v225_v51 = vadd.f32 %v224_v48, %v206_v44  ;;  %v2446_v53 = vcvt.f32.s32 %v2445_v52  ;;  %v2741_v16 = vsel %vm163_vm1, %v175_v13, 0.0  ;;  %v3491_v48 = vsub.s32 4, %v2723_v4 }
  0x41   : > { %v361_v41 = vrot.slane %v2741_v16, %v2728_v11  ;;  %v288_v42 = vrot.slane %v2741_v16, %v2731_v12  ;;  %v747_v46 = vrot.slane %v3007_v35, %v3220_v39  ;;  %v754_v47 = vrot.slane %v2741_v16, %v3220_v39 }
  0x42   : > { %v2449_v54 = vtrunc.f32 %v225_v51  ;;  %vm227_vm15 = vcmp.gt.s32.totalorder %v2446_v53, 0  ;;  %v986_v51 = vrot.slane %v3007_v35, %v3367_v43  ;;  %v993_v52 = vrot.slane %v2741_v16, %v3367_v43 }
  0x43   : > { %v228_v57 = vsel %vm227_vm15, %v2446_v53, 0  ;;  %v1232_v9 = vrot.slane %v2741_v16, %v3491_v48 }
  0x44   : > { %v2450_v56 = vcvt.f32.s32 %v2449_v54  ;;  %vm229_vm2 = vcmp.lt.s32.totalorder %v228_v57, 6 }
  0x45   : > { %v230_v61 = vsel %vm229_vm2, %v228_v57, 6 }
  0x46   : > { %vm237_vm3 = vcmp.gt.s32.totalorder %v2450_v56, 0  ;;  %v246_v63 = vmul.u32 512, %v230_v61 }
  0x47   : > { %v238_v62 = vsel %vm237_vm3, %v2450_v56, 0 }
  0x48   : > { %vm239_vm5 = vcmp.lt.s32.totalorder %v238_v62, 16  ;;  %v248_v2 = vadd.s32 %v247_v59, %v246_v63 }
  0x49   : > { %v240_v1 = vsel %vm239_vm5, %v238_v62, 16 }
  0x4a   : > { %v249_v3 = vmul.u32 16, %v240_v1 }
  0x4c   : > { %v250_v8 = vadd.s32 %v249_v3, %v248_v2 }
  0x4e   : > { %v2725_v10 = vadd.s32 %v250_v8, %v245_v6  ;;  %v1225_v8 = vrot.slane %v3007_v35, %v3491_v48 }
  0x50   : > { %v2734_v14 = vand.u32 127, %v2725_v10  ;;  %v2988_v34 = vshra.s32 %v2725_v10, 7 }
  0x52   : > { %v2745_v17 = vrot.slane %v2734_v14, %v2728_v11  ;;  %v2749_v18 = vrot.slane %v2734_v14, %v2731_v12  ;;  %v3011_v36 = vrot.slane %v2988_v34, %v2728_v11  ;;  %v3015_v37 = vrot.slane %v2988_v34, %v2731_v12 }
  0x53   : > { %v3234_v40 = vrot.slane %v2734_v14, %v3220_v39  ;;  %v740_v44 = vrot.slane %v2988_v34, %v3220_v39  ;;  %v3379_v45 = vrot.slane %v2734_v14, %v3367_v43  ;;  %v979_v49 = vrot.slane %v2988_v34, %v3367_v43 }
  0x54   : > { %vm384_vm7 = vcmp.eq.s32.totalorder %v2737_v15, %v2745_v17  ;;  %vm311_vm8 = vcmp.eq.s32.totalorder %v2737_v15, %v2749_v18  ;;  %vm383_vm1 = vcmp.eq.s32.totalorder %v2752_v19, %v2745_v17  ;;  %vm310_vm9 = vcmp.eq.s32.totalorder %v2752_v19, %v2749_v18 }
  0x55   : > { %2035 = vmatpush3.xpose.msk.msra.mxu0 %vm384_vm7, %v2614_v5  ;;  %2076 = vmatpush3.xpose.msk.msra.mxu1 %vm311_vm8, %v2614_v5  ;;  %vm382_vm10 = vcmp.eq.s32.totalorder %v2773_v20, %v2745_v17  ;;  %vm309_vm11 = vcmp.eq.s32.totalorder %v2773_v20, %v2749_v18  ;;  %vm381_vm12 = vcmp.eq.s32.totalorder %v2790_v21, %v2745_v17 }
  0x56   : > { %2036 = vmatprep.subr.mxu0 %v2612_v0  ;;  %2077 = vmatprep.subr.mxu1 %v2612_v0  ;;  %vm308_vm13 = vcmp.eq.s32.totalorder %v2790_v21, %v2749_v18  ;;  %vm380_vm14 = vcmp.eq.s32.totalorder %v2807_v22, %v2745_v17  ;;  %vm307_vm15 = vcmp.eq.s32.totalorder %v2807_v22, %v2749_v18 }
  0x57   : > { %vm3710_vm2 = vcmp.eq.s32.totalorder %v2824_v23, %v2745_v17  ;;  %vm3709_vm3 = vcmp.eq.s32.totalorder %v2824_v23, %v2749_v18  ;;  %vm3712_vm5 = vcmp.eq.s32.totalorder %v2841_v24, %v2745_v17  ;;  %vm3711_vm6 = vcmp.eq.s32.totalorder %v2841_v24, %v2749_v18 }
  0x58   : > { %vm3729_vm4 = vcmp.eq.s32.totalorder %v2723_v4, %v3011_v36  ;;  %v3503_v50 = vrot.slane %v2734_v14, %v3491_v48  ;;  %v1218_v7 = vrot.slane %v2988_v34, %v3491_v48 }
  0x59   : > { %2037 = vmatpush3.xpose.msk.msra.mxu0 %vm383_vm1, %v2614_v5  ;;  %2078 = vmatpush3.xpose.msk.msra.mxu1 %vm310_vm9, %v2614_v5 }
  0x5a   : > { %2038 = vmatprep.subr.mxu0 %v2612_v0  ;;  %2079 = vmatprep.subr.mxu1 %v2612_v0 }
  0x5d   : > { %2039 = vmatpush3.xpose.msk.msra.mxu0 %vm382_vm10, %v2614_v5  ;;  %2080 = vmatpush3.xpose.msk.msra.mxu1 %vm309_vm11, %v2614_v5 }
  0x5e   : > { %2040 = vmatprep.subr.mxu0 %v2612_v0  ;;  %2081 = vmatprep.subr.mxu1 %v2612_v0 }
  0x61   : > { %2041 = vmatpush3.xpose.msk.msra.mxu0 %vm381_vm12, %v2614_v5  ;;  %2082 = vmatpush3.xpose.msk.msra.mxu1 %vm308_vm13, %v2614_v5 }
  0x62   : > { %2042 = vmatprep.subr.mxu0 %v2612_v0  ;;  %2083 = vmatprep.subr.mxu1 %v2612_v0 }
  0x65   : > { %2043 = vmatpush3.xpose.msk.msra.mxu0 %vm380_vm14, %v2614_v5  ;;  %2084 = vmatpush3.xpose.msk.msra.mxu1 %vm307_vm15, %v2614_v5 }
  0x66   : > { %2044 = vmatprep.subr.mxu0 %v2612_v0  ;;  %2085 = vmatprep.subr.mxu1 %v2612_v0 }
  0x69   : > { %2045 = vmatpush3.xpose.msk.msra.mxu0 %vm3710_vm2, %v2614_v5  ;;  %2086 = vmatpush3.xpose.msk.msra.mxu1 %vm3709_vm3, %v2614_v5  ;;  %vm3714_vm3 = vcmp.eq.s32.totalorder %v2858_v26, %v2745_v17  ;;  %vm3713_vm2 = vcmp.eq.s32.totalorder %v2858_v26, %v2749_v18 }
  0x6a   : > { %2046 = vmatprep.subr.mxu0 %v2612_v0  ;;  %2087 = vmatprep.subr.mxu1 %v2612_v0 }
  0x6d   : > { %2047 = vmatpush3.xpose.msk.msra.mxu0 %vm3712_vm5, %v2614_v5  ;;  %2088 = vmatpush3.xpose.msk.msra.mxu1 %vm3711_vm6, %v2614_v5  ;;  %vm3716_vm6 = vcmp.eq.s32.totalorder %v2875_v27, %v2745_v17  ;;  %vm3715_vm5 = vcmp.eq.s32.totalorder %v2875_v27, %v2749_v18 }
  0x6e   : > { %2048 = vmatprep.subr.mxu0 %v2612_v0  ;;  %2089 = vmatprep.subr.mxu1 %v2612_v0 }
  0x71   : > { %2049 = vmatpush3.xpose.msk.msra.mxu0 %vm3714_vm3, %v2614_v5  ;;  %2090 = vmatpush3.xpose.msk.msra.mxu1 %vm3713_vm2, %v2614_v5  ;;  %vm3718_vm2 = vcmp.eq.s32.totalorder %v2892_v28, %v2745_v17  ;;  %vm3717_vm3 = vcmp.eq.s32.totalorder %v2892_v28, %v2749_v18 }
  0x72   : > { %2050 = vmatprep.subr.mxu0 %v2612_v0  ;;  %2091 = vmatprep.subr.mxu1 %v2612_v0 }
  0x75   : > { %2051 = vmatpush3.xpose.msk.msra.mxu0 %vm3716_vm6, %v2614_v5  ;;  %2092 = vmatpush3.xpose.msk.msra.mxu1 %vm3715_vm5, %v2614_v5  ;;  %vm3720_vm5 = vcmp.eq.s32.totalorder %v2909_v29, %v2745_v17  ;;  %vm3719_vm6 = vcmp.eq.s32.totalorder %v2909_v29, %v2749_v18 }
  0x76   : > { %2052 = vmatprep.subr.mxu0 %v2612_v0  ;;  %2093 = vmatprep.subr.mxu1 %v2612_v0 }
  0x79   : > { %2053 = vmatpush3.xpose.msk.msra.mxu0 %vm3718_vm2, %v2614_v5  ;;  %2094 = vmatpush3.xpose.msk.msra.mxu1 %vm3717_vm3, %v2614_v5  ;;  %vm3722_vm3 = vcmp.eq.s32.totalorder %v2926_v30, %v2745_v17  ;;  %vm3721_vm2 = vcmp.eq.s32.totalorder %v2926_v30, %v2749_v18 }
  0x7a   : > { %2054 = vmatprep.subr.mxu0 %v2612_v0  ;;  %2095 = vmatprep.subr.mxu1 %v2612_v0 }
  0x7d   : > { %2055 = vmatpush3.xpose.msk.msra.mxu0 %vm3720_vm5, %v2614_v5  ;;  %2096 = vmatpush3.xpose.msk.msra.mxu1 %vm3719_vm6, %v2614_v5  ;;  %vm3724_vm6 = vcmp.eq.s32.totalorder %v2943_v31, %v2745_v17  ;;  %vm3723_vm5 = vcmp.eq.s32.totalorder %v2943_v31, %v2749_v18 }
  0x7e   : > { %2056 = vmatprep.subr.mxu0 %v2612_v0  ;;  %2097 = vmatprep.subr.mxu1 %v2612_v0 }
  0x81   : > { %2057 = vmatpush3.xpose.msk.msra.mxu0 %vm3722_vm3, %v2614_v5  ;;  %2098 = vmatpush3.xpose.msk.msra.mxu1 %vm3721_vm2, %v2614_v5  ;;  %vm371_vm2 = vcmp.eq.s32.totalorder %v2960_v32, %v2745_v17  ;;  %vm3727_vm3 = vcmp.eq.s32.totalorder %v2960_v32, %v2749_v18 }
  0x82   : > { %2058 = vmatprep.subr.mxu0 %v2612_v0  ;;  %2099 = vmatprep.subr.mxu1 %v2612_v0 }
  0x85   : > { %2059 = vmatpush3.xpose.msk.msra.mxu0 %vm3724_vm6, %v2614_v5  ;;  %2100 = vmatpush3.xpose.msk.msra.mxu1 %vm3723_vm5, %v2614_v5  ;;  %vm3726_vm5 = vcmp.eq.s32.totalorder %v2977_v33, %v2745_v17  ;;  %vm3725_vm6 = vcmp.eq.s32.totalorder %v2977_v33, %v2749_v18 }
  0x86   : > { %2060 = vmatprep.subr.mxu0 %v2612_v0  ;;  %2101 = vmatprep.subr.mxu1 %v2612_v0 }
  0x89   : > { %2061 = vmatpush3.xpose.msk.msra.mxu0 %vm371_vm2, %v2614_v5  ;;  %2102 = vmatpush3.xpose.msk.msra.mxu1 %vm3727_vm3, %v2614_v5  ;;  %vm275_vm3 = vcmp.eq.s32.totalorder %v2723_v4, %v3015_v37 }
  0x8a   : > { %2062 = vmatprep.subr.mxu0 %v2612_v0  ;;  %2103 = vmatprep.subr.mxu1 %v2612_v0 }
  0x8d   : > { %2063 = vmatpush3.xpose.msk.msra.mxu0 %vm3726_vm5, %v2614_v5  ;;  %2104 = vmatpush3.xpose.msk.msra.mxu1 %vm3725_vm6, %v2614_v5  ;;  %vm369_vm6 = vcmp.eq.s32.totalorder %v2723_v4, %v2745_v17  ;;  %vm3728_vm5 = vcmp.eq.s32.totalorder %v2723_v4, %v2749_v18 }
  0x8e   : > { %2064 = vmatprep.subr.mxu0 %v2612_v0  ;;  %2105 = vmatprep.subr.mxu1 %v2612_v0 }
  0x91   : > { %2065 = vmatpush3.xpose.msk.msra.mxu0 %vm369_vm6, %v2614_v5  ;;  %2106 = vmatpush3.xpose.msk.msra.mxu1 %vm3728_vm5, %v2614_v5  ;;  %vm349_vm5 = vcmp.eq.s32.totalorder %v2977_v33, %v3011_v36 }
  0x92   : > { %2116 = vmatprep.subr.mxu0 %v2612_v0  ;;  %2157 = vmatprep.subr.mxu1 %v2612_v0 }
  0x94   : > { %2067 = vmatmul.mubr.msk.f32.vlgmr.msra.gmra.mxu0 %vm3729_vm4, %v354_v25  ;;  %2108 = vmatmul.mubr.msk.f32.vlgmr.msra.gmra.mxu1 %vm275_vm3, %v281_v38  ;;  %vm276_vm4 = vcmp.eq.s32.totalorder %v2977_v33, %v3015_v37 }
  0x95   : > { %2117 = vmatpush3.xpose.msk.msra.mxu0 %vm384_vm7, %v2614_v5  ;;  %2158 = vmatpush3.xpose.msk.msra.mxu1 %vm311_vm8, %v2614_v5  ;;  %vm350_vm7 = vcmp.eq.s32.totalorder %v2960_v32, %v3011_v36  ;;  %vm277_vm8 = vcmp.eq.s32.totalorder %v2960_v32, %v3015_v37 }
  0x96   : > { %2118 = vmatprep.subr.mxu0 %v2612_v0  ;;  %2159 = vmatprep.subr.mxu1 %v2612_v0 }
  0x97   : > { %2069 = vmatprep.mubr.msk.f32.mxu0 %vm2613_vm0, %v2612_v0  ;;  %2110 = vmatprep.mubr.msk.f32.mxu1 %vm2613_vm0, %v2612_v0 }
  0x98   : > { %2070 = vmatmul.mubr.msk.f32.gmra.mxu0 %vm349_vm5, %v354_v25  ;;  %2111 = vmatmul.mubr.msk.f32.gmra.mxu1 %vm276_vm4, %v281_v38 }
  0x99   : > { %2119 = vmatpush3.xpose.msk.msra.mxu0 %vm383_vm1, %v2614_v5  ;;  %2160 = vmatpush3.xpose.msk.msra.mxu1 %vm310_vm9, %v2614_v5  ;;  %vm3734_vm1 = vcmp.eq.s32.totalorder %v2824_v23, %v2745_v17  ;;  %vm3735_vm9 = vcmp.eq.s32.totalorder %v2824_v23, %v2749_v18 }
  0x9a   : > { %2120 = vmatprep.subr.mxu0 %v2612_v0  ;;  %2161 = vmatprep.subr.mxu1 %v2612_v0 }
  0x9b   : > { %2072 = vmatprep.mubr.msk.f32.mxu0 %vm2613_vm0, %v2612_v0  ;;  %2113 = vmatprep.mubr.msk.f32.mxu1 %vm2613_vm0, %v2612_v0 }
  0x9c   : > { %2073 = vmatmul.mubr.msk.f32.gmra.mxu0 %vm350_vm7, %v354_v25  ;;  %2114 = vmatmul.mubr.msk.f32.gmra.mxu1 %vm277_vm8, %v281_v38 }
  0x9d   : > { %2121 = vmatpush3.xpose.msk.msra.mxu0 %vm382_vm10, %v2614_v5  ;;  %2162 = vmatpush3.xpose.msk.msra.mxu1 %vm309_vm11, %v2614_v5  ;;  %vm3736_vm10 = vcmp.eq.s32.totalorder %v2841_v24, %v2745_v17  ;;  %vm3737_vm11 = vcmp.eq.s32.totalorder %v2841_v24, %v2749_v18 }
  0x9e   : > { %2122 = vmatprep.subr.mxu0 %v2612_v0  ;;  %2163 = vmatprep.subr.mxu1 %v2612_v0 }
  0x9f   : > { %2148 = vmatprep.mubr.msk.f32.mxu0 %vm2613_vm0, %v2612_v0  ;;  %2189 = vmatprep.mubr.msk.f32.mxu1 %vm2613_vm0, %v2612_v0 }
  0xa1   : > { %2123 = vmatpush3.xpose.msk.msra.mxu0 %vm381_vm12, %v2614_v5  ;;  %2164 = vmatpush3.xpose.msk.msra.mxu1 %vm308_vm13, %v2614_v5  ;;  %vm3738_vm12 = vcmp.eq.s32.totalorder %v2858_v26, %v2745_v17  ;;  %vm3739_vm13 = vcmp.eq.s32.totalorder %v2858_v26, %v2749_v18 }
  0xa2   : > { %2124 = vmatprep.subr.mxu0 %v2612_v0  ;;  %2165 = vmatprep.subr.mxu1 %v2612_v0 }
  0xa5   : > { %2125 = vmatpush3.xpose.msk.msra.mxu0 %vm380_vm14, %v2614_v5  ;;  %2166 = vmatpush3.xpose.msk.msra.mxu1 %vm307_vm15, %v2614_v5  ;;  %vm3740_vm14 = vcmp.eq.s32.totalorder %v2875_v27, %v2745_v17  ;;  %vm3741_vm15 = vcmp.eq.s32.totalorder %v2875_v27, %v2749_v18 }
  0xa6   : > { %2126 = vmatprep.subr.mxu0 %v2612_v0  ;;  %2167 = vmatprep.subr.mxu1 %v2612_v0 }
  0xa9   : > { %2127 = vmatpush3.xpose.msk.msra.mxu0 %vm3734_vm1, %v2614_v5  ;;  %2168 = vmatpush3.xpose.msk.msra.mxu1 %vm3735_vm9, %v2614_v5  ;;  %vm3742_vm1 = vcmp.eq.s32.totalorder %v2892_v28, %v2745_v17  ;;  %vm3743_vm9 = vcmp.eq.s32.totalorder %v2892_v28, %v2749_v18 }
  0xaa   : > { %2128 = vmatprep.subr.mxu0 %v2612_v0  ;;  %2169 = vmatprep.subr.mxu1 %v2612_v0 }
  0xad   : > { %2129 = vmatpush3.xpose.msk.msra.mxu0 %vm3736_vm10, %v2614_v5  ;;  %2170 = vmatpush3.xpose.msk.msra.mxu1 %vm3737_vm11, %v2614_v5  ;;  %vm3744_vm10 = vcmp.eq.s32.totalorder %v2909_v29, %v2745_v17  ;;  %vm3745_vm11 = vcmp.eq.s32.totalorder %v2909_v29, %v2749_v18 }
  0xae   : > { %2130 = vmatprep.subr.mxu0 %v2612_v0  ;;  %2171 = vmatprep.subr.mxu1 %v2612_v0 }
  0xb1   : > { %2131 = vmatpush3.xpose.msk.msra.mxu0 %vm3738_vm12, %v2614_v5  ;;  %2172 = vmatpush3.xpose.msk.msra.mxu1 %vm3739_vm13, %v2614_v5  ;;  %vm3746_vm12 = vcmp.eq.s32.totalorder %v2926_v30, %v2745_v17  ;;  %vm3747_vm13 = vcmp.eq.s32.totalorder %v2926_v30, %v2749_v18 }
  0xb2   : > { %2132 = vmatprep.subr.mxu0 %v2612_v0  ;;  %2173 = vmatprep.subr.mxu1 %v2612_v0 }
  0xb5   : > { %2133 = vmatpush3.xpose.msk.msra.mxu0 %vm3740_vm14, %v2614_v5  ;;  %2174 = vmatpush3.xpose.msk.msra.mxu1 %vm3741_vm15, %v2614_v5  ;;  %vm3748_vm14 = vcmp.eq.s32.totalorder %v2943_v31, %v2745_v17  ;;  %vm3749_vm15 = vcmp.eq.s32.totalorder %v2943_v31, %v2749_v18 }
  0xb6   : > { %2134 = vmatprep.subr.mxu0 %v2612_v0  ;;  %2175 = vmatprep.subr.mxu1 %v2612_v0 }
  0xb9   : > { %2135 = vmatpush3.xpose.msk.msra.mxu0 %vm3742_vm1, %v2614_v5  ;;  %2176 = vmatpush3.xpose.msk.msra.mxu1 %vm3743_vm9, %v2614_v5  ;;  %vm3750_vm1 = vcmp.eq.s32.totalorder %v2960_v32, %v2749_v18  ;;  %vm3751_vm9 = vcmp.eq.s32.totalorder %v2977_v33, %v2745_v17 }
  0xba   : > { %2136 = vmatprep.subr.mxu0 %v2612_v0  ;;  %2177 = vmatprep.subr.mxu1 %v2612_v0 }
  0xbd   : > { %2137 = vmatpush3.xpose.msk.msra.mxu0 %vm3744_vm10, %v2614_v5  ;;  %2178 = vmatpush3.xpose.msk.msra.mxu1 %vm3745_vm11, %v2614_v5  ;;  %vm3753_vm10 = vcmp.eq.s32.totalorder %v2723_v4, %v2749_v18  ;;  %vm777_vm11 = vcmp.eq.s32.totalorder %v2737_v15, %v3234_v40 }
  0xbe   : > { %2138 = vmatprep.subr.mxu0 %v2612_v0  ;;  %2179 = vmatprep.subr.mxu1 %v2612_v0 }
  0xc1   : > { %2139 = vmatpush3.xpose.msk.msra.mxu0 %vm3746_vm12, %v2614_v5  ;;  %2180 = vmatpush3.xpose.msk.msra.mxu1 %vm3747_vm13, %v2614_v5  ;;  %vm3754_vm12 = vcmp.eq.s32.totalorder %v2723_v4, %v3011_v36  ;;  %vm770_vm13 = vcmp.eq.s32.totalorder %v2858_v26, %v3234_v40 }
  0xc2   : > { %2140 = vmatprep.subr.mxu0 %v2612_v0  ;;  %2181 = vmatprep.subr.mxu1 %v2612_v0 }
  0xc5   : > { %2141 = vmatpush3.xpose.msk.msra.mxu0 %vm3748_vm14, %v2614_v5  ;;  %2182 = vmatpush3.xpose.msk.msra.mxu1 %vm3749_vm15, %v2614_v5  ;;  %vm769_vm14 = vcmp.eq.s32.totalorder %v2875_v27, %v3234_v40  ;;  %vm768_vm15 = vcmp.eq.s32.totalorder %v2892_v28, %v3234_v40 }
  0xc6   : > { %2142 = vmatprep.subr.mxu0 %v2612_v0  ;;  %2183 = vmatprep.subr.mxu1 %v2612_v0 }
  0xc9   : > { %2143 = vmatpush3.xpose.msk.msra.mxu0 %vm371_vm2, %v2614_v5  ;;  %2184 = vmatpush3.xpose.msk.msra.mxu1 %vm3750_vm1, %v2614_v5  ;;  %vm3752_vm2 = vcmp.eq.s32.totalorder %v2977_v33, %v2749_v18  ;;  %vm767_vm1 = vcmp.eq.s32.totalorder %v2909_v29, %v3234_v40 }
  0xca   : > { %2144 = vmatprep.subr.mxu0 %v2612_v0  ;;  %2185 = vmatprep.subr.mxu1 %v2612_v0 }
  0xcd   : > { %2145 = vmatpush3.xpose.msk.msra.mxu0 %vm3751_vm9, %v2614_v5  ;;  %2186 = vmatpush3.xpose.msk.msra.mxu1 %vm3752_vm2, %v2614_v5  ;;  %vm766_vm9 = vcmp.eq.s32.totalorder %v2926_v30, %v3234_v40  ;;  %vm765_vm2 = vcmp.eq.s32.totalorder %v2943_v31, %v3234_v40 }
  0xce   : > { %2146 = vmatprep.subr.mxu0 %v2612_v0  ;;  %2187 = vmatprep.subr.mxu1 %v2612_v0 }
  0xd1   : > { %2147 = vmatpush3.xpose.msk.msra.mxu0 %vm369_vm6, %v2614_v5  ;;  %2188 = vmatpush3.xpose.msk.msra.mxu1 %vm3753_vm10, %v2614_v5  ;;  %vm776_vm6 = vcmp.eq.s32.totalorder %v2752_v19, %v3234_v40  ;;  %vm764_vm10 = vcmp.eq.s32.totalorder %v2960_v32, %v3234_v40 }
  0xd2   : > { %2198 = vmatprep.subr.mxu0 %v2612_v0  ;;  %2239 = vmatprep.subr.mxu1 %v2612_v0 }
  0xd4   : > { %2149 = vmatmul.mubr.msk.f32.vlgmr.msra.gmra.mxu0 %vm3754_vm12, %v361_v41  ;;  %2190 = vmatmul.mubr.msk.f32.vlgmr.msra.gmra.mxu1 %vm275_vm3, %v288_v42  ;;  %vm775_vm3 = vcmp.eq.s32.totalorder %v2773_v20, %v3234_v40  ;;  %vm762_vm12 = vcmp.eq.s32.totalorder %v2723_v4, %v3234_v40 }
  0xd5   : > { %2199 = vmatpush3.xpose.msk.msra.mxu0 %vm777_vm11, %v2614_v5  ;;  %2240 = vmatpush3.xpose.msk.msra.mxu1 %vm777_vm11, %v2614_v5  ;;  %vm763_vm11 = vcmp.eq.s32.totalorder %v2977_v33, %v3234_v40 }
  0xd6   : > { %2200 = vmatprep.subr.mxu0 %v2612_v0  ;;  %2241 = vmatprep.subr.mxu1 %v2612_v0 }
  0xd7   : > { %2151 = vmatprep.mubr.msk.f32.mxu0 %vm2613_vm0, %v2612_v0  ;;  %2192 = vmatprep.mubr.msk.f32.mxu1 %vm2613_vm0, %v2612_v0 }
  0xd8   : > { %2152 = vmatmul.mubr.msk.f32.gmra.mxu0 %vm349_vm5, %v361_v41  ;;  %2193 = vmatmul.mubr.msk.f32.gmra.mxu1 %vm276_vm4, %v288_v42  ;;  %vm774_vm5 = vcmp.eq.s32.totalorder %v2790_v21, %v3234_v40  ;;  %vm773_vm4 = vcmp.eq.s32.totalorder %v2807_v22, %v3234_v40 }
  0xd9   : > { %2201 = vmatpush3.xpose.msk.msra.mxu0 %vm776_vm6, %v2614_v5  ;;  %2242 = vmatpush3.xpose.msk.msra.mxu1 %vm776_vm6, %v2614_v5  ;;  %vm741_vm6 = vcmp.eq.s32.totalorder %v2723_v4, %v740_v44 }
  0xda   : > { %2202 = vmatprep.subr.mxu0 %v2612_v0  ;;  %2243 = vmatprep.subr.mxu1 %v2612_v0 }
  0xdb   : > { %2154 = vmatprep.mubr.msk.f32.mxu0 %vm2613_vm0, %v2612_v0  ;;  %2195 = vmatprep.mubr.msk.f32.mxu1 %vm2613_vm0, %v2612_v0 }
  0xdc   : > { %2155 = vmatmul.mubr.msk.f32.gmra.mxu0 %vm350_vm7, %v361_v41  ;;  %2196 = vmatmul.mubr.msk.f32.gmra.mxu1 %vm277_vm8, %v288_v42  ;;  %vm772_vm7 = vcmp.eq.s32.totalorder %v2824_v23, %v3234_v40  ;;  %vm771_vm8 = vcmp.eq.s32.totalorder %v2841_v24, %v3234_v40 }
  0xdd   : > { %2203 = vmatpush3.xpose.msk.msra.mxu0 %vm775_vm3, %v2614_v5  ;;  %2244 = vmatpush3.xpose.msk.msra.mxu1 %vm775_vm3, %v2614_v5  ;;  %vm1016_vm3 = vcmp.eq.s32.totalorder %v2737_v15, %v3379_v45 }
  0xde   : > { %2204 = vmatprep.subr.mxu0 %v2612_v0  ;;  %2245 = vmatprep.subr.mxu1 %v2612_v0 }
  0xdf   : > { %2230 = vmatprep.mubr.msk.f32.mxu0 %vm2613_vm0, %v2612_v0  ;;  %2271 = vmatprep.mubr.msk.f32.mxu1 %vm2613_vm0, %v2612_v0 }
  0xe1   : > { %2205 = vmatpush3.xpose.msk.msra.mxu0 %vm774_vm5, %v2614_v5  ;;  %2246 = vmatpush3.xpose.msk.msra.mxu1 %vm774_vm5, %v2614_v5  ;;  %vm742_vm5 = vcmp.eq.s32.totalorder %v2977_v33, %v740_v44 }
  0xe2   : > { %2206 = vmatprep.subr.mxu0 %v2612_v0  ;;  %2247 = vmatprep.subr.mxu1 %v2612_v0 }
  0xe5   : > { %2207 = vmatpush3.xpose.msk.msra.mxu0 %vm773_vm4, %v2614_v5  ;;  %2248 = vmatpush3.xpose.msk.msra.mxu1 %vm773_vm4, %v2614_v5  ;;  %vm1015_vm4 = vcmp.eq.s32.totalorder %v2752_v19, %v3379_v45 }
  0xe6   : > { %2208 = vmatprep.subr.mxu0 %v2612_v0  ;;  %2249 = vmatprep.subr.mxu1 %v2612_v0 }
  0xe9   : > { %2209 = vmatpush3.xpose.msk.msra.mxu0 %vm772_vm7, %v2614_v5  ;;  %2250 = vmatpush3.xpose.msk.msra.mxu1 %vm772_vm7, %v2614_v5  ;;  %vm743_vm7 = vcmp.eq.s32.totalorder %v2960_v32, %v740_v44 }
  0xea   : > { %2210 = vmatprep.subr.mxu0 %v2612_v0  ;;  %2251 = vmatprep.subr.mxu1 %v2612_v0 }
  0xed   : > { %2211 = vmatpush3.xpose.msk.msra.mxu0 %vm771_vm8, %v2614_v5  ;;  %2252 = vmatpush3.xpose.msk.msra.mxu1 %vm771_vm8, %v2614_v5  ;;  %vm1014_vm8 = vcmp.eq.s32.totalorder %v2773_v20, %v3379_v45 }
  0xee   : > { %2212 = vmatprep.subr.mxu0 %v2612_v0  ;;  %2253 = vmatprep.subr.mxu1 %v2612_v0 }
  0xf1   : > { %2213 = vmatpush3.xpose.msk.msra.mxu0 %vm770_vm13, %v2614_v5  ;;  %2254 = vmatpush3.xpose.msk.msra.mxu1 %vm770_vm13, %v2614_v5  ;;  %vm1013_vm13 = vcmp.eq.s32.totalorder %v2790_v21, %v3379_v45 }
  0xf2   : > { %2214 = vmatprep.subr.mxu0 %v2612_v0  ;;  %2255 = vmatprep.subr.mxu1 %v2612_v0 }
  0xf5   : > { %2215 = vmatpush3.xpose.msk.msra.mxu0 %vm769_vm14, %v2614_v5  ;;  %2256 = vmatpush3.xpose.msk.msra.mxu1 %vm769_vm14, %v2614_v5  ;;  %vm1012_vm14 = vcmp.eq.s32.totalorder %v2807_v22, %v3379_v45 }
  0xf6   : > { %2216 = vmatprep.subr.mxu0 %v2612_v0  ;;  %2257 = vmatprep.subr.mxu1 %v2612_v0 }
  0xf9   : > { %2217 = vmatpush3.xpose.msk.msra.mxu0 %vm768_vm15, %v2614_v5  ;;  %2258 = vmatpush3.xpose.msk.msra.mxu1 %vm768_vm15, %v2614_v5  ;;  %vm1011_vm15 = vcmp.eq.s32.totalorder %v2824_v23, %v3379_v45 }
  0xfa   : > { %2218 = vmatprep.subr.mxu0 %v2612_v0  ;;  %2259 = vmatprep.subr.mxu1 %v2612_v0 }
  0xfd   : > { %2219 = vmatpush3.xpose.msk.msra.mxu0 %vm767_vm1, %v2614_v5  ;;  %2260 = vmatpush3.xpose.msk.msra.mxu1 %vm767_vm1, %v2614_v5  ;;  %vm1010_vm1 = vcmp.eq.s32.totalorder %v2841_v24, %v3379_v45 }
  0xfe   : > { %2220 = vmatprep.subr.mxu0 %v2612_v0  ;;  %2261 = vmatprep.subr.mxu1 %v2612_v0 }
 0x101   : > { %2221 = vmatpush3.xpose.msk.msra.mxu0 %vm766_vm9, %v2614_v5  ;;  %2262 = vmatpush3.xpose.msk.msra.mxu1 %vm766_vm9, %v2614_v5  ;;  %vm1009_vm9 = vcmp.eq.s32.totalorder %v2858_v26, %v3379_v45 }
 0x102   : > { %2222 = vmatprep.subr.mxu0 %v2612_v0  ;;  %2263 = vmatprep.subr.mxu1 %v2612_v0 }
 0x105   : > { %2223 = vmatpush3.xpose.msk.msra.mxu0 %vm765_vm2, %v2614_v5  ;;  %2264 = vmatpush3.xpose.msk.msra.mxu1 %vm765_vm2, %v2614_v5  ;;  %vm1008_vm2 = vcmp.eq.s32.totalorder %v2875_v27, %v3379_v45 }
 0x106   : > { %2224 = vmatprep.subr.mxu0 %v2612_v0  ;;  %2265 = vmatprep.subr.mxu1 %v2612_v0 }
 0x109   : > { %2225 = vmatpush3.xpose.msk.msra.mxu0 %vm764_vm10, %v2614_v5  ;;  %2266 = vmatpush3.xpose.msk.msra.mxu1 %vm764_vm10, %v2614_v5  ;;  %vm1007_vm10 = vcmp.eq.s32.totalorder %v2892_v28, %v3379_v45 }
 0x10a   : > { %2226 = vmatprep.subr.mxu0 %v2612_v0  ;;  %2267 = vmatprep.subr.mxu1 %v2612_v0 }
 0x10d   : > { %2227 = vmatpush3.xpose.msk.msra.mxu0 %vm763_vm11, %v2614_v5  ;;  %2268 = vmatpush3.xpose.msk.msra.mxu1 %vm763_vm11, %v2614_v5  ;;  %vm1006_vm11 = vcmp.eq.s32.totalorder %v2909_v29, %v3379_v45 }
 0x10e   : > { %2228 = vmatprep.subr.mxu0 %v2612_v0  ;;  %2269 = vmatprep.subr.mxu1 %v2612_v0 }
 0x111   : > { %2229 = vmatpush3.xpose.msk.msra.mxu0 %vm762_vm12, %v2614_v5  ;;  %2270 = vmatpush3.xpose.msk.msra.mxu1 %vm762_vm12, %v2614_v5  ;;  %vm1005_vm12 = vcmp.eq.s32.totalorder %v2926_v30, %v3379_v45 }
 0x112   : > { %2280 = vmatprep.subr.mxu0 %v2612_v0  ;;  %2321 = vmatprep.subr.mxu1 %v2612_v0 }
 0x114   : > { %2231 = vmatmul.mubr.msk.f32.vlgmr.msra.gmra.mxu0 %vm741_vm6, %v747_v46  ;;  %2272 = vmatmul.mubr.msk.f32.vlgmr.msra.gmra.mxu1 %vm741_vm6, %v754_v47  ;;  %vm1004_vm6 = vcmp.eq.s32.totalorder %v2943_v31, %v3379_v45 }
 0x115   : > { %2281 = vmatpush3.xpose.msk.msra.mxu0 %vm1016_vm3, %v2614_v5  ;;  %2322 = vmatpush3.xpose.msk.msra.mxu1 %vm1016_vm3, %v2614_v5  ;;  %vm1003_vm3 = vcmp.eq.s32.totalorder %v2960_v32, %v3379_v45 }
 0x116   : > { %2233 = vmatprep.mubr.msk.f32.mxu0 %vm2613_vm0, %v2612_v0  ;;  %2274 = vmatprep.mubr.msk.f32.mxu1 %vm2613_vm0, %v2612_v0 }
 0x117   : > { %2282 = vmatprep.subr.mxu0 %v2612_v0  ;;  %2323 = vmatprep.subr.mxu1 %v2612_v0 }
 0x118   : > { %2234 = vmatmul.mubr.msk.f32.gmra.mxu0 %vm742_vm5, %v747_v46  ;;  %2275 = vmatmul.mubr.msk.f32.gmra.mxu1 %vm742_vm5, %v754_v47  ;;  %vm1002_vm5 = vcmp.eq.s32.totalorder %v2977_v33, %v3379_v45 }
 0x119   : > { %2283 = vmatpush3.xpose.msk.msra.mxu0 %vm1015_vm4, %v2614_v5  ;;  %2324 = vmatpush3.xpose.msk.msra.mxu1 %vm1015_vm4, %v2614_v5  ;;  %vm1001_vm4 = vcmp.eq.s32.totalorder %v2723_v4, %v3379_v45 }
 0x11a   : > { %2236 = vmatprep.mubr.msk.f32.mxu0 %vm2613_vm0, %v2612_v0  ;;  %2277 = vmatprep.mubr.msk.f32.mxu1 %vm2613_vm0, %v2612_v0 }
 0x11b   : > { %2284 = vmatprep.subr.mxu0 %v2612_v0  ;;  %2325 = vmatprep.subr.mxu1 %v2612_v0 }
 0x11c   : > { %2237 = vmatmul.mubr.msk.f32.gmra.mxu0 %vm743_vm7, %v747_v46  ;;  %2278 = vmatmul.mubr.msk.f32.gmra.mxu1 %vm743_vm7, %v754_v47  ;;  %vm980_vm7 = vcmp.eq.s32.totalorder %v2723_v4, %v979_v49 }
 0x11d   : > { %2285 = vmatpush3.xpose.msk.msra.mxu0 %vm1014_vm8, %v2614_v5  ;;  %2326 = vmatpush3.xpose.msk.msra.mxu1 %vm1014_vm8, %v2614_v5  ;;  %vm1255_vm8 = vcmp.eq.s32.totalorder %v2737_v15, %v3503_v50 }
 0x11e   : > { %2286 = vmatprep.subr.mxu0 %v2612_v0  ;;  %2327 = vmatprep.subr.mxu1 %v2612_v0 }
 0x11f   : > { %2312 = vmatprep.mubr.msk.f32.mxu0 %vm2613_vm0, %v2612_v0  ;;  %2353 = vmatprep.mubr.msk.f32.mxu1 %vm2613_vm0, %v2612_v0 }
 0x121   : > { %2287 = vmatpush3.xpose.msk.msra.mxu0 %vm1013_vm13, %v2614_v5  ;;  %2328 = vmatpush3.xpose.msk.msra.mxu1 %vm1013_vm13, %v2614_v5  ;;  %vm981_vm13 = vcmp.eq.s32.totalorder %v2977_v33, %v979_v49 }
 0x122   : > { %2288 = vmatprep.subr.mxu0 %v2612_v0  ;;  %2329 = vmatprep.subr.mxu1 %v2612_v0 }
 0x125   : > { %2289 = vmatpush3.xpose.msk.msra.mxu0 %vm1012_vm14, %v2614_v5  ;;  %2330 = vmatpush3.xpose.msk.msra.mxu1 %vm1012_vm14, %v2614_v5  ;;  %vm1254_vm14 = vcmp.eq.s32.totalorder %v2752_v19, %v3503_v50 }
 0x126   : > { %2290 = vmatprep.subr.mxu0 %v2612_v0  ;;  %2331 = vmatprep.subr.mxu1 %v2612_v0 }
 0x129   : > { %2291 = vmatpush3.xpose.msk.msra.mxu0 %vm1011_vm15, %v2614_v5  ;;  %2332 = vmatpush3.xpose.msk.msra.mxu1 %vm1011_vm15, %v2614_v5  ;;  %vm982_vm15 = vcmp.eq.s32.totalorder %v2960_v32, %v979_v49 }
 0x12a   : > { %2292 = vmatprep.subr.mxu0 %v2612_v0  ;;  %2333 = vmatprep.subr.mxu1 %v2612_v0 }
 0x12d   : > { %2293 = vmatpush3.xpose.msk.msra.mxu0 %vm1010_vm1, %v2614_v5  ;;  %2334 = vmatpush3.xpose.msk.msra.mxu1 %vm1010_vm1, %v2614_v5  ;;  %vm1253_vm1 = vcmp.eq.s32.totalorder %v2773_v20, %v3503_v50 }
 0x12e   : > { %2294 = vmatprep.subr.mxu0 %v2612_v0  ;;  %2335 = vmatprep.subr.mxu1 %v2612_v0 }
 0x131   : > { %2295 = vmatpush3.xpose.msk.msra.mxu0 %vm1009_vm9, %v2614_v5  ;;  %2336 = vmatpush3.xpose.msk.msra.mxu1 %vm1009_vm9, %v2614_v5  ;;  %vm1252_vm9 = vcmp.eq.s32.totalorder %v2790_v21, %v3503_v50 }
 0x132   : > { %2296 = vmatprep.subr.mxu0 %v2612_v0  ;;  %2337 = vmatprep.subr.mxu1 %v2612_v0 }
 0x135   : > { %2297 = vmatpush3.xpose.msk.msra.mxu0 %vm1008_vm2, %v2614_v5  ;;  %2338 = vmatpush3.xpose.msk.msra.mxu1 %vm1008_vm2, %v2614_v5  ;;  %vm1251_vm2 = vcmp.eq.s32.totalorder %v2807_v22, %v3503_v50 }
 0x136   : > { %2298 = vmatprep.subr.mxu0 %v2612_v0  ;;  %2339 = vmatprep.subr.mxu1 %v2612_v0 }
 0x139   : > { %2299 = vmatpush3.xpose.msk.msra.mxu0 %vm1007_vm10, %v2614_v5  ;;  %2340 = vmatpush3.xpose.msk.msra.mxu1 %vm1007_vm10, %v2614_v5  ;;  %vm1250_vm10 = vcmp.eq.s32.totalorder %v2824_v23, %v3503_v50 }
 0x13a   : > { %2300 = vmatprep.subr.mxu0 %v2612_v0  ;;  %2341 = vmatprep.subr.mxu1 %v2612_v0 }
 0x13d   : > { %2301 = vmatpush3.xpose.msk.msra.mxu0 %vm1006_vm11, %v2614_v5  ;;  %2342 = vmatpush3.xpose.msk.msra.mxu1 %vm1006_vm11, %v2614_v5  ;;  %vm1249_vm11 = vcmp.eq.s32.totalorder %v2841_v24, %v3503_v50 }
 0x13e   : > { %2302 = vmatprep.subr.mxu0 %v2612_v0  ;;  %2343 = vmatprep.subr.mxu1 %v2612_v0 }
 0x141   : > { %2303 = vmatpush3.xpose.msk.msra.mxu0 %vm1005_vm12, %v2614_v5  ;;  %2344 = vmatpush3.xpose.msk.msra.mxu1 %vm1005_vm12, %v2614_v5  ;;  %vm1248_vm12 = vcmp.eq.s32.totalorder %v2858_v26, %v3503_v50 }
 0x142   : > { %2304 = vmatprep.subr.mxu0 %v2612_v0  ;;  %2345 = vmatprep.subr.mxu1 %v2612_v0 }
 0x145   : > { %2305 = vmatpush3.xpose.msk.msra.mxu0 %vm1004_vm6, %v2614_v5  ;;  %2346 = vmatpush3.xpose.msk.msra.mxu1 %vm1004_vm6, %v2614_v5  ;;  %vm1247_vm6 = vcmp.eq.s32.totalorder %v2875_v27, %v3503_v50 }
 0x146   : > { %2306 = vmatprep.subr.mxu0 %v2612_v0  ;;  %2347 = vmatprep.subr.mxu1 %v2612_v0 }
 0x149   : > { %2307 = vmatpush3.xpose.msk.msra.mxu0 %vm1003_vm3, %v2614_v5  ;;  %2348 = vmatpush3.xpose.msk.msra.mxu1 %vm1003_vm3, %v2614_v5  ;;  %vm1246_vm3 = vcmp.eq.s32.totalorder %v2892_v28, %v3503_v50 }
 0x14a   : > { %2308 = vmatprep.subr.mxu0 %v2612_v0  ;;  %2349 = vmatprep.subr.mxu1 %v2612_v0 }
 0x14d   : > { %2309 = vmatpush3.xpose.msk.msra.mxu0 %vm1002_vm5, %v2614_v5  ;;  %2350 = vmatpush3.xpose.msk.msra.mxu1 %vm1002_vm5, %v2614_v5  ;;  %vm1245_vm5 = vcmp.eq.s32.totalorder %v2909_v29, %v3503_v50 }
 0x14e   : > { %2310 = vmatprep.subr.mxu0 %v2612_v0  ;;  %2351 = vmatprep.subr.mxu1 %v2612_v0 }
 0x151   : > { %2311 = vmatpush3.xpose.msk.msra.mxu0 %vm1001_vm4, %v2614_v5  ;;  %2352 = vmatpush3.xpose.msk.msra.mxu1 %vm1001_vm4, %v2614_v5  ;;  %vm1244_vm4 = vcmp.eq.s32.totalorder %v2926_v30, %v3503_v50 }
 0x152   : > { %2362 = vmatprep.subr.mxu0 %v2612_v0  ;;  %2403 = vmatprep.subr.mxu1 %v2612_v0 }
 0x154   : > { %v483_v53 = vpop.f32.mrf.mxu0  ;;  %v563_v54 = vpop.f32.mrf.mxu1  ;;  %2313 = vmatmul.mubr.msk.f32.vlgmr.msra.gmra.mxu0 %vm980_vm7, %v986_v51  ;;  %2354 = vmatmul.mubr.msk.f32.vlgmr.msra.gmra.mxu1 %vm980_vm7, %v993_v52  ;;  %vm1243_vm7 = vcmp.eq.s32.totalorder %v2943_v31, %v3503_v50 }
 0x155   : > { %v3516_v55 = vadd.f32 %v563_v54, %v483_v53  ;;  %2363 = vmatpush3.xpose.msk.msra.mxu0 %vm1255_vm8, %v2614_v5  ;;  %2404 = vmatpush3.xpose.msk.msra.mxu1 %vm1255_vm8, %v2614_v5  ;;  %vm1242_vm8 = vcmp.eq.s32.totalorder %v2960_v32, %v3503_v50 }
 0x156   : > { %v2068_v56 = vpop.f32.mrf.mxu0  ;;  %v2109_v57 = vpop.f32.mrf.mxu1  ;;  %2315 = vmatprep.mubr.msk.f32.mxu0 %vm2613_vm0, %v2612_v0  ;;  %2356 = vmatprep.mubr.msk.f32.mxu1 %vm2613_vm0, %v2612_v0 }
 0x157   : > { %2364 = vmatprep.subr.mxu0 %v2612_v0  ;;  %2405 = vmatprep.subr.mxu1 %v2612_v0 }
 0x158   : > { %2316 = vmatmul.mubr.msk.f32.gmra.mxu0 %vm981_vm13, %v986_v51  ;;  %2357 = vmatmul.mubr.msk.f32.gmra.mxu1 %vm981_vm13, %v993_v52  ;;  %v488_v58 = vpop.f32.mrf.mxu0  ;;  %v568_v59 = vpop.f32.mrf.mxu1  ;;  %vm1241_vm13 = vcmp.eq.s32.totalorder %v2977_v33, %v3503_v50 }
 0x159   : > { %2365 = vmatpush3.xpose.msk.msra.mxu0 %vm1254_vm14, %v2614_v5  ;;  %2406 = vmatpush3.xpose.msk.msra.mxu1 %vm1254_vm14, %v2614_v5  ;;  %v3532_v60 = vadd.f32 %v568_v59, %v488_v58  ;;  %vm1240_vm14 = vcmp.eq.s32.totalorder %v2723_v4, %v3503_v50 }
 0x15a   : > { %2318 = vmatprep.mubr.msk.f32.mxu0 %vm2613_vm0, %v2612_v0  ;;  %2359 = vmatprep.mubr.msk.f32.mxu1 %vm2613_vm0, %v2612_v0  ;;  %v2071_v61 = vpop.f32.mrf.mxu0  ;;  %v2112_v62 = vpop.f32.mrf.mxu1 }
 0x15b   : > { %2366 = vmatprep.subr.mxu0 %v2612_v0  ;;  %2407 = vmatprep.subr.mxu1 %v2612_v0 }
 0x15c   : > { %2319 = vmatmul.mubr.msk.f32.gmra.mxu0 %vm982_vm15, %v986_v51  ;;  %2360 = vmatmul.mubr.msk.f32.gmra.mxu1 %vm982_vm15, %v993_v52  ;;  %v493_v63 = vpop.f32.mrf.mxu0  ;;  %v573_v1 = vpop.f32.mrf.mxu1  ;;  %vm1219_vm15 = vcmp.eq.s32.totalorder %v2723_v4, %v1218_v7 }
 0x15d   : > { %2367 = vmatpush3.xpose.msk.msra.mxu0 %vm1253_vm1, %v2614_v5  ;;  %2408 = vmatpush3.xpose.msk.msra.mxu1 %vm1253_vm1, %v2614_v5  ;;  %v3544_v2 = vadd.f32 %v573_v1, %v493_v63  ;;  %vm1220_vm1 = vcmp.eq.s32.totalorder %v2977_v33, %v1218_v7 }
 0x15e   : > { %2368 = vmatprep.subr.mxu0 %v2612_v0  ;;  %2409 = vmatprep.subr.mxu1 %v2612_v0  ;;  %v2074_v3 = vpop.f32.mrf.mxu0  ;;  %v2115_v6 = vpop.f32.mrf.mxu1 }
 0x15f   : > { %2394 = vmatprep.mubr.msk.f32.mxu0 %vm2613_vm0, %v2612_v0  ;;  %2435 = vmatprep.mubr.msk.f32.mxu1 %vm2613_vm0, %v2612_v0 }
 0x161   : > { %2369 = vmatpush3.xpose.msk.msra.mxu0 %vm1252_vm9, %v2614_v5  ;;  %2410 = vmatpush3.xpose.msk.msra.mxu1 %vm1252_vm9, %v2614_v5  ;;  %vm1221_vm9 = vcmp.eq.s32.totalorder %v2960_v32, %v1218_v7 }
 0x162   : > { %2370 = vmatprep.subr.mxu0 %v2612_v0  ;;  %2411 = vmatprep.subr.mxu1 %v2612_v0 }
 0x165   : > { %2371 = vmatpush3.xpose.msk.msra.mxu0 %vm1251_vm2, %v2614_v5  ;;  %2412 = vmatpush3.xpose.msk.msra.mxu1 %vm1251_vm2, %v2614_v5 }
 0x166   : > { %2372 = vmatprep.subr.mxu0 %v2612_v0  ;;  %2413 = vmatprep.subr.mxu1 %v2612_v0 }
 0x169   : > { %2373 = vmatpush3.xpose.msk.msra.mxu0 %vm1250_vm10, %v2614_v5  ;;  %2414 = vmatpush3.xpose.msk.msra.mxu1 %vm1250_vm10, %v2614_v5 }
 0x16a   : > { %2374 = vmatprep.subr.mxu0 %v2612_v0  ;;  %2415 = vmatprep.subr.mxu1 %v2612_v0 }
 0x16d   : > { %2375 = vmatpush3.xpose.msk.msra.mxu0 %vm1249_vm11, %v2614_v5  ;;  %2416 = vmatpush3.xpose.msk.msra.mxu1 %vm1249_vm11, %v2614_v5 }
 0x16e   : > { %2376 = vmatprep.subr.mxu0 %v2612_v0  ;;  %2417 = vmatprep.subr.mxu1 %v2612_v0 }
 0x171   : > { %2377 = vmatpush3.xpose.msk.msra.mxu0 %vm1248_vm12, %v2614_v5  ;;  %2418 = vmatpush3.xpose.msk.msra.mxu1 %vm1248_vm12, %v2614_v5 }
 0x172   : > { %2378 = vmatprep.subr.mxu0 %v2612_v0  ;;  %2419 = vmatprep.subr.mxu1 %v2612_v0 }
 0x175   : > { %2379 = vmatpush3.xpose.msk.msra.mxu0 %vm1247_vm6, %v2614_v5  ;;  %2420 = vmatpush3.xpose.msk.msra.mxu1 %vm1247_vm6, %v2614_v5 }
 0x176   : > { %2380 = vmatprep.subr.mxu0 %v2612_v0  ;;  %2421 = vmatprep.subr.mxu1 %v2612_v0 }
 0x179   : > { %2381 = vmatpush3.xpose.msk.msra.mxu0 %vm1246_vm3, %v2614_v5  ;;  %2422 = vmatpush3.xpose.msk.msra.mxu1 %vm1246_vm3, %v2614_v5 }
 0x17a   : > { %2382 = vmatprep.subr.mxu0 %v2612_v0  ;;  %2423 = vmatprep.subr.mxu1 %v2612_v0 }
 0x17d   : > { %2383 = vmatpush3.xpose.msk.msra.mxu0 %vm1245_vm5, %v2614_v5  ;;  %2424 = vmatpush3.xpose.msk.msra.mxu1 %vm1245_vm5, %v2614_v5 }
 0x17e   : > { %2384 = vmatprep.subr.mxu0 %v2612_v0  ;;  %2425 = vmatprep.subr.mxu1 %v2612_v0 }
 0x181   : > { %2385 = vmatpush3.xpose.msk.msra.mxu0 %vm1244_vm4, %v2614_v5  ;;  %2426 = vmatpush3.xpose.msk.msra.mxu1 %vm1244_vm4, %v2614_v5 }
 0x182   : > { %2386 = vmatprep.subr.mxu0 %v2612_v0  ;;  %2427 = vmatprep.subr.mxu1 %v2612_v0 }
 0x185   : > { %2387 = vmatpush3.xpose.msk.msra.mxu0 %vm1243_vm7, %v2614_v5  ;;  %2428 = vmatpush3.xpose.msk.msra.mxu1 %vm1243_vm7, %v2614_v5 }
 0x186   : > { %2388 = vmatprep.subr.mxu0 %v2612_v0  ;;  %2429 = vmatprep.subr.mxu1 %v2612_v0 }
 0x189   : > { %2389 = vmatpush3.xpose.msk.msra.mxu0 %vm1242_vm8, %v2614_v5  ;;  %2430 = vmatpush3.xpose.msk.msra.mxu1 %vm1242_vm8, %v2614_v5 }
 0x18a   : > { %2390 = vmatprep.subr.mxu0 %v2612_v0  ;;  %2431 = vmatprep.subr.mxu1 %v2612_v0 }
 0x18d   : > { %2391 = vmatpush3.xpose.msk.msra.mxu0 %vm1241_vm13, %v2614_v5  ;;  %2432 = vmatpush3.xpose.msk.msra.mxu1 %vm1241_vm13, %v2614_v5 }
 0x18e   : > { %2392 = vmatprep.subr.mxu0 %v2612_v0  ;;  %2433 = vmatprep.subr.mxu1 %v2612_v0 }
 0x191   : > { %2393 = vmatpush3.xpose.msk.msra.mxu0 %vm1240_vm14, %v2614_v5  ;;  %2434 = vmatpush3.xpose.msk.msra.mxu1 %vm1240_vm14, %v2614_v5 }
 0x194   : > { %v643_v10 = vpop.f32.mrf.mxu0  ;;  %v723_v11 = vpop.f32.mrf.mxu1  ;;  %2395 = vmatmul.mubr.msk.f32.vlgmr.msra.gmra.mxu0 %vm1219_vm15, %v1225_v8  ;;  %2436 = vmatmul.mubr.msk.f32.vlgmr.msra.gmra.mxu1 %vm1219_vm15, %v1232_v9 }
 0x195   : > { %v724_v12 = vadd.f32 %v723_v11, %v643_v10  ;;  %2397 = vmatprep.mubr.msk.f32.mxu0 %vm2613_vm0, %v2612_v0  ;;  %2438 = vmatprep.mubr.msk.f32.mxu1 %vm2613_vm0, %v2612_v0 }
 0x196   : > { %v2150_v13 = vpop.f32.mrf.mxu0  ;;  %v2191_v14 = vpop.f32.mrf.mxu1 }
 0x198   : > { %2398 = vmatmul.mubr.msk.f32.gmra.mxu0 %vm1220_vm1, %v1225_v8  ;;  %2439 = vmatmul.mubr.msk.f32.gmra.mxu1 %vm1220_vm1, %v1232_v9  ;;  %v648_v15 = vpop.f32.mrf.mxu0  ;;  %v728_v16 = vpop.f32.mrf.mxu1 }
 0x199   : > { %2400 = vmatprep.mubr.msk.f32.mxu0 %vm2613_vm0, %v2612_v0  ;;  %2441 = vmatprep.mubr.msk.f32.mxu1 %vm2613_vm0, %v2612_v0  ;;  %v729_v4 = vadd.f32 %v728_v16, %v648_v15 }
 0x19a   : > { %v2153_v17 = vpop.f32.mrf.mxu0  ;;  %v2194_v18 = vpop.f32.mrf.mxu1 }
 0x19c   : > { %2401 = vmatmul.mubr.msk.f32.gmra.mxu0 %vm1221_vm9, %v1225_v8  ;;  %2442 = vmatmul.mubr.msk.f32.gmra.mxu1 %vm1221_vm9, %v1232_v9  ;;  %v653_v19 = vpop.f32.mrf.mxu0  ;;  %v733_v5 = vpop.f32.mrf.mxu1 }
 0x19d   : > { %v734_v20 = vadd.f32 %v733_v5, %v653_v19 }
 0x19e   : > { %v2156_v21 = vpop.f32.mrf.mxu0  ;;  %v2197_v22 = vpop.f32.mrf.mxu1 }
 0x1d4   : > { %v876_v23 = vpop.f32.mrf.mxu0  ;;  %v959_v24 = vpop.f32.mrf.mxu1 }
 0x1d5   : > { %v890_v26 = vadd.f32 %v876_v23, %v3516_v55  ;;  %v973_v27 = vadd.f32 %v959_v24, %v724_v12 }
 0x1d6   : > { %v2232_v28 = vpop.f32.mrf.mxu0  ;;  %v2273_v29 = vpop.f32.mrf.mxu1 }
 0x1d8   : > { %v881_v0 = vpop.f32.mrf.mxu0  ;;  %v964_v30 = vpop.f32.mrf.mxu1 }
 0x1d9   : > { %v891_v31 = vadd.f32 %v881_v0, %v3532_v60  ;;  %v974_v32 = vadd.f32 %v964_v30, %v729_v4 }
 0x1da   : > { %v2235_v33 = vpop.f32.mrf.mxu0  ;;  %v2276_v34 = vpop.f32.mrf.mxu1 }
 0x1dc   : > { %v886_v35 = vpop.f32.mrf.mxu0  ;;  %v969_v36 = vpop.f32.mrf.mxu1 }
 0x1dd   : > { %v892_v37 = vadd.f32 %v886_v35, %v3544_v2  ;;  %v975_v25 = vadd.f32 %v969_v36, %v734_v20 }
 0x1de   : > { %v2238_v38 = vpop.f32.mrf.mxu0  ;;  %v2279_v39 = vpop.f32.mrf.mxu1 }
 0x214   : > { %v1115_v40 = vpop.f32.mrf.mxu0  ;;  %v1198_v41 = vpop.f32.mrf.mxu1 }
 0x215   : > { %v1129_v52 = vadd.f32 %v1115_v40, %v890_v26  ;;  %v1212_v53 = vadd.f32 %v1198_v41, %v973_v27 }
 0x216   : > { %v2314_v42 = vpop.f32.mrf.mxu0  ;;  %v2355_v43 = vpop.f32.mrf.mxu1 }
 0x218   : > { %v1120_v44 = vpop.f32.mrf.mxu0  ;;  %v1203_v45 = vpop.f32.mrf.mxu1 }
 0x219   : > { %v1130_v60 = vadd.f32 %v1120_v44, %v891_v31  ;;  %v1213_v61 = vadd.f32 %v1203_v45, %v974_v32 }
 0x21a   : > { %v2317_v46 = vpop.f32.mrf.mxu0  ;;  %v2358_v47 = vpop.f32.mrf.mxu1 }
 0x21c   : > { %v1125_v48 = vpop.f32.mrf.mxu0  ;;  %v1208_v49 = vpop.f32.mrf.mxu1 }
 0x21d   : > { %v1131_v7 = vadd.f32 %v1125_v48, %v892_v37  ;;  %v1214_v8 = vadd.f32 %v1208_v49, %v975_v25 }
 0x21e   : > { %v2320_v50 = vpop.f32.mrf.mxu0  ;;  %v2361_v51 = vpop.f32.mrf.mxu1 }
 0x254   : > { %v1354_v54 = vpop.f32.mrf.mxu0  ;;  %v1437_v55 = vpop.f32.mrf.mxu1 }
 0x255   : > { %v1368_v56 = vadd.f32 %v1354_v54, %v1129_v52  ;;  %v1451_v57 = vadd.f32 %v1437_v55, %v1212_v53 }
 0x256   : > { %v2396_v58 = vpop.f32.mrf.mxu0  ;;  %v2437_v59 = vpop.f32.mrf.mxu1 }
 0x257   : > { %1460 = vst [vmem:[%s136_s13] sm:$0xff] %v1368_v56  ;;  %1469 = vst [vmem:[%s136_s13 + $0x18] sm:$0xff] %v1451_v57 }
 0x258   : > { %v1359_v62 = vpop.f32.mrf.mxu0  ;;  %v1442_v63 = vpop.f32.mrf.mxu1 }
 0x259   : > { %v1369_v1 = vadd.f32 %v1359_v62, %v1130_v60  ;;  %v1452_v2 = vadd.f32 %v1442_v63, %v1213_v61 }
 0x25a   : > { %v2399_v3 = vpop.f32.mrf.mxu0  ;;  %v2440_v6 = vpop.f32.mrf.mxu1 }
 0x25b   : > { %1461 = vst [vmem:[%s136_s13 + $0x8] sm:$0xff] %v1369_v1  ;;  %1470 = vst [vmem:[%s136_s13 + $0x20] sm:$0xff] %v1452_v2 }
 0x25c   : > { %v1364_v9 = vpop.f32.mrf.mxu0  ;;  %v1447_v10 = vpop.f32.mrf.mxu1 }
 0x25d   : > { %v1370_v11 = vadd.f32 %v1364_v9, %v1131_v7  ;;  %v1453_v12 = vadd.f32 %v1447_v10, %v1214_v8 }
 0x25e   : > { %v2402_v13 = vpop.f32.mrf.mxu0  ;;  %v2443_v14 = vpop.f32.mrf.mxu1 }
 0x25f   : > { %1462 = vst [vmem:[%s136_s13 + $0x10] sm:$0xff] %v1370_v11  ;;  %1471 = vst [vmem:[%s136_s13 + $0x28] sm:$0xff] %v1453_v12 }
 0x260   : > { %2544 = shalt.err (!%p2541_p10)
}
 0x261   : > { %s2545_s4 = scalar_lea.hbm %s3655_s27, 768  ;;  %s2549_s7 = scalar_lea.hbm %s3708_s2, 1536 }
 0x262   : > { %p2546_p11 = scmp.ne.s32.totalorder %s3655_s27, %s2545_s4  ;;  %p2550_p1 = scmp.lt.s32.totalorder %s3655_s27, %s3708_s2 }
 0x263   : > { %p2551_p2 = scmp.lt.s32.totalorder %s2549_s7, %s2545_s4 }
 0x264   : > { %p2547_p12 = pnand %p2546_p11, %p2676_p9 }
 0x265   : > { %p2552_p3 = por %p2551_p2, %p2550_p1 }
 0x266   : > { %p2548_p0 = pneg %p2547_p12 }
 0x268   : > { %p2553_p4 = pnand %p2552_p3, %p2548_p0 }
 0x26a   : > { %2556 = shalt.err (!%p2553_p4)
}
 0x26b   : > { %s2616_s10 = smov 128   ;;  %s2617_s11 = smov 8  }
 0x26c   : > { %2454 = dma.vmem_to_hbm [thread:$0]  (%p2676_p9), %s3657_s20, 768, %s3655_s27, %s3661_s16, %s2616_s10, %s2616_s10, %s2617_s11  }
 0x26d PF: > { %p2460_p5 = scmp.ge.s32.totalorder %s2609_s18, 2  ;;  %s1501_s12 = sand.u32 1, %s2589_s14  }
 0x26e   : > { %s1502_s13 = scalar_lea.sflag [#allocation5], %s1501_s12 }
 0x26f   : > { %p2457_p6 = pnand %p2460_p5, %p2683_p13 }
 0x271   : > { %p2458_p7 = pneg %p2457_p6 }
 0x273   : > { %2584 = dma.done.wait (%p2458_p7), %s1502_s13, 768  }
 0x274   : > { %2586 = vsyncadd (%p2458_p7), %s1502_s13, 4294966528  ;;  %s21_s18 = sadd.s32 1, %s2609_s18   ;;  %s3755_s14 = smov %s2593_s15 }
 0x275   : > { %p18_p8 = scmp.ge.s32.totalorder %s21_s18, 4   ;;  %s3756_s15 = smov %s2597_s0 }
 0x276   : > { %s3757_s0 = smov %s2689_s26  ;;  %s3758_s16 = smov %s2605_s17 }
 0x277   : > { %s3759_s17 = smov %s3761_s21  ;;  %20 = sbr.rel (!%p18_p8) target bundleno = 19 (0x13), region = 63 }
 0x27c   :  { %1507 = vsyncpa [#allocation5], 1 }
 0x27d   :  { %1509 = vsyncpa [#allocation5 + $0x1], 1 }

</bundles_post_ra>
